<compile_context>
chip_gen: v6e
topology: v6e:2x2x1
jax: 0.10.0
libtpu: 0.0.40
codegen_flags: <defaults>
</compile_context>

<pallas_src>
import math
import functools

import jax
import jax.numpy as jnp
from jax.experimental import pallas as pl
from jax.experimental.pallas import tpu as pltpu


# ----------------------------- in-kernel helpers -----------------------------

def _layernorm(x, g, b, eps=1e-5):
    mu = jnp.mean(x, axis=-1, keepdims=True)
    var = jnp.mean((x - mu) ** 2, axis=-1, keepdims=True)
    return (x - mu) * jax.lax.rsqrt(var + eps) * g + b


def _encoder_layer(x, mask3, nhead,
                   wqkv, bqkv, wo, bo, w1, b1, w2, b2,
                   ln1g, ln1b, ln2g, ln2b):
    """PyTorch nn.TransformerEncoderLayer (post-norm, relu) for one batch row.

    x: (S, D) f32; mask3: (1, 1, S) with 1.0 = valid key.
    The 1/sqrt(head_dim) scale is pre-folded into the Q part of wqkv/bqkv.
    """
    S, D = x.shape
    hd = D // nhead

    # fused QKV projection: one MXU push with 3*D output lanes.
    qkv = jnp.dot(x, wqkv, preferred_element_type=jnp.float32) + bqkv     # (S, 3D)
    q = qkv[:, 0:D]
    k = qkv[:, D:2 * D]
    v = qkv[:, 2 * D:3 * D]

    # head-major (H, S, hd); all attention math is batched over heads.
    qh = jnp.stack([q[:, h * hd:(h + 1) * hd] for h in range(nhead)], axis=0)
    kh = jnp.stack([k[:, h * hd:(h + 1) * hd] for h in range(nhead)], axis=0)
    vh = jnp.stack([v[:, h * hd:(h + 1) * hd] for h in range(nhead)], axis=0)

    s = jnp.einsum('hqd,hkd->hqk', qh, kh,
                   preferred_element_type=jnp.float32)                    # (H, S, S)
    # key-padding mask (kept in f32 so masked probs are exactly ~0)
    s = jnp.where(mask3 > 0.5, s, -1e30)
    s = s - jnp.max(s, axis=-1, keepdims=True)
    p = jnp.exp(s)
    p = p * pl.reciprocal(jnp.sum(p, axis=-1, keepdims=True), approx=True)
    ctx = jnp.einsum('hqk,hkd->hqd', p, vh,
                     preferred_element_type=jnp.float32)                  # (H, S, hd)
    attn = jnp.concatenate([ctx[h] for h in range(nhead)], axis=-1)       # (S, D)
    attn = jnp.dot(attn, wo, preferred_element_type=jnp.float32) + bo

    x = _layernorm(x + attn, ln1g, ln1b)
    ff = jnp.maximum(jnp.dot(x, w1, preferred_element_type=jnp.float32) + b1, 0.0)
    ff = jnp.dot(ff, w2, preferred_element_type=jnp.float32) + b2
    return _layernorm(x + ff, ln2g, ln2b)


# --------------------------------- fused kernel -------------------------------

def fused_encoder_kernel(nhead1, nhead2,
                         ids_ref,                        # SMEM (B, S) int32 (scalar prefetch)
                         mask_ref,                       # (1, 1, S) f32
                         emb_ref, pe_ref,                # (V, 1, E), (S, E)
                         l1_wqkv, l1_bqkv, l1_wo, l1_bo,
                         l1_w1, l1_b1, l1_w2, l1_b2,
                         l1_ln1g, l1_ln1b, l1_ln2g, l1_ln2b,
                         lnf_g, lnf_b, ext_w, ext_b,
                         l2_wqkv, l2_bqkv, l2_wo, l2_bo,
                         l2_w1, l2_b1, l2_w2, l2_b2,
                         l2_ln1g, l2_ln1b, l2_ln2g, l2_ln2b,
                         o_ref):                         # (1, 1, D2)
    b = pl.program_id(0)
    S = pe_ref.shape[0]

    # 1. embedding row gather (SMEM ids -> VMEM table rows) + positional enc.
    #    (emb_dropout / positional dropout are eval-mode identity)
    rows = [emb_ref[ids_ref[b, s]] for s in range(S)]             # each (1, E)
    x = jnp.concatenate(rows, axis=0) + pe_ref[...]               # (S, E)

    mask3 = mask_ref[...]                                         # (1, 1, S)
    mask2 = mask_ref[0]                                           # (1, S)

    # 2. utterEnc: 1 x TransformerEncoderLayer + final LayerNorm
    x = _encoder_layer(x, mask3, nhead1,
                       l1_wqkv[...], l1_bqkv[...], l1_wo[...], l1_bo[...],
                       l1_w1[...], l1_b1[...], l1_w2[...], l1_b2[...],
                       l1_ln1g[...], l1_ln1b[...], l1_ln2g[...], l1_ln2b[...])
    x = _layernorm(x, lnf_g[...], lnf_b[...])

    # 3. ext: Linear(d_model -> d_model * multi_emb)
    x = jnp.dot(x, ext_w[...], preferred_element_type=jnp.float32) + ext_b[...]

    # 4. multi_pre: TransformerEncoderLayer (d_model*multi_emb, nhead=multi_emb)
    x = _encoder_layer(x, mask3, nhead2,
                       l2_wqkv[...], l2_bqkv[...], l2_wo[...], l2_bo[...],
                       l2_w1[...], l2_b1[...], l2_w2[...], l2_b2[...],
                       l2_ln1g[...], l2_ln1b[...], l2_ln2g[...], l2_ln2b[...])

    # 5. universal_sentence_embedding: masked sum over seq / sqrt(valid count)
    sums = jnp.dot(mask2, x, preferred_element_type=jnp.float32)          # (1, D2)
    cnt = jnp.sum(mask2, axis=-1, keepdims=True)                          # (1, 1)
    o_ref[...] = (sums * jax.lax.rsqrt(cnt))[None, :, :]


# --------------------------------- wrapper ------------------------------------

def encoder_forward(params, x_ids):
    B, S = x_ids.shape
    E = params['pe'].shape[1]
    M = params['multi_emb']
    D2 = E * M
    V = params['emb'].shape[0]

    ids = x_ids.astype(jnp.int32)
    mask_f = (x_ids != 0).astype(jnp.float32).reshape(B, 1, S)
    emb3 = params['emb'].reshape(V, 1, E)       # gather dim on the untiled axis

    weights = (emb3, params['pe'],
               *params['layer1'],
               params['lnf_g'], params['lnf_b'],
               params['ext_w'], params['ext_b'],
               *params['layer2'])

    def full_spec(a):
        # whole-array block, constant index -> stays VMEM-resident across grid
        return pl.BlockSpec(a.shape, lambda b, ids_ref, _n=a.ndim: (0,) * _n)

    grid_spec = pltpu.PrefetchScalarGridSpec(
        num_scalar_prefetch=1,                 # ids -> SMEM
        grid=(B,),
        in_specs=[pl.BlockSpec((1, 1, S), lambda b, ids_ref: (b, 0, 0))]
                 + [full_spec(w) for w in weights],
        out_specs=pl.BlockSpec((1, 1, D2), lambda b, ids_ref: (b, 0, 0)),
    )

    kernel = functools.partial(fused_encoder_kernel, params['nhead1'], M)
    out = pl.pallas_call(
        kernel,
        out_shape=jax.ShapeDtypeStruct((B, 1, D2), jnp.float32),
        grid_spec=grid_spec,
        compiler_params=pltpu.CompilerParams(
            dimension_semantics=("parallel",)),
    )(ids, mask_f, *weights)
    return out.reshape(B, M, D2 // M)


# ------------------------------ parameter init --------------------------------

def make_pe(S, E):
    pos = jnp.arange(S, dtype=jnp.float32)[:, None]
    div = jnp.exp(jnp.arange(0, E, 2, dtype=jnp.float32) * (-math.log(10000.0) / E))
    pe = jnp.zeros((S, E), jnp.float32)
    pe = pe.at[:, 0::2].set(jnp.sin(pos * div))
    pe = pe.at[:, 1::2].set(jnp.cos(pos * div))
    return pe


def _prep_layer(wq, wk, wv, bq, bk, bv, wo, bo, w1, b1, w2, b2,
                ln1g, ln1b, ln2g, ln2b, nhead):
    """Fuse Q/K/V into one (D, 3D) weight and fold 1/sqrt(head_dim) into Q."""
    D = wq.shape[0]
    scale = 1.0 / math.sqrt(D // nhead)
    wqkv = jnp.concatenate([wq * scale, wk, wv], axis=1)
    bqkv = jnp.concatenate([bq * scale, bk, bv], axis=1)
    return (wqkv, bqkv, wo, bo, w1, b1, w2, b2, ln1g, ln1b, ln2g, ln2b)


def init_params(key, vocab, E, nhead1, ff, M):
    keys = jax.random.split(key, 64)
    kit = iter(keys)

    def w(shape, scale=0.05):
        return jax.random.normal(next(kit), shape, jnp.float32) * scale

    def layer(D, F, nhead):
        return _prep_layer(
            w((D, D)), w((D, D)), w((D, D)),
            w((1, D)), w((1, D)), w((1, D)),
            w((D, D)), w((1, D)),
            w((D, F)), w((1, F)), w((F, D)), w((1, D)),
            jnp.ones((1, D), jnp.float32), jnp.zeros((1, D), jnp.float32),
            jnp.ones((1, D), jnp.float32), jnp.zeros((1, D), jnp.float32),
            nhead)

    D2 = E * M
    return dict(
        emb=w((vocab, E), 1.0),
        nhead1=nhead1,
        multi_emb=M,
        layer1=layer(E, ff, nhead1),
        lnf_g=jnp.ones((1, E), jnp.float32),
        lnf_b=jnp.zeros((1, E), jnp.float32),
        ext_w=w((E, D2)),
        ext_b=w((1, D2)),
        layer2=layer(D2, ff, M),
    )


# ---------------------------------- main --------------------------------------

if __name__ == "__main__":
    # small shapes: vocab=50, emb=d_model=32, nhead=1, multi_emb=2, ffn=64, B=2, S=8
    B, S, V, E, NHEAD, M, FF = 2, 8, 50, 32, 1, 2, 64

    key = jax.random.PRNGKey(0)
    k_ids, k_params = jax.random.split(key)

    x = jax.random.randint(k_ids, (B, S), 1, V, dtype=jnp.int32)
    # simulate padding (token id 0) at the end of each sequence
    x = x.at[0, 6:].set(0)
    x = x.at[1, 5:].set(0)

    params = init_params(k_params, V, E, NHEAD, FF, M)
    params['pe'] = make_pe(S, E)

    # TODO(synk): dropout layers are omitted (eval-mode identity); training-mode
    # stochastic dropout is not reproduced.
    out = encoder_forward(params, x)
    jax.block_until_ready(out)
    assert out.shape == (B, M, E) and out.dtype == jnp.float32
    print("KERNEL_OK")
</pallas_src>

<mosaic_0001>
module attributes {stable_mosaic.version = 11 : i64} {
  func.func @fused_encoder_kernel(%arg0: i32, %arg1: memref<2x8xi32, #tpu.memory_space<smem>>, %arg2: memref<1x1x8xf32, #tpu.memory_space<vmem>>, %arg3: memref<50x1x32xf32, #tpu.memory_space<vmem>>, %arg4: memref<8x32xf32, #tpu.memory_space<vmem>>, %arg5: memref<32x96xf32, #tpu.memory_space<vmem>>, %arg6: memref<1x96xf32, #tpu.memory_space<vmem>>, %arg7: memref<32x32xf32, #tpu.memory_space<vmem>>, %arg8: memref<1x32xf32, #tpu.memory_space<vmem>>, %arg9: memref<32x64xf32, #tpu.memory_space<vmem>>, %arg10: memref<1x64xf32, #tpu.memory_space<vmem>>, %arg11: memref<64x32xf32, #tpu.memory_space<vmem>>, %arg12: memref<1x32xf32, #tpu.memory_space<vmem>>, %arg13: memref<1x32xf32, #tpu.memory_space<vmem>>, %arg14: memref<1x32xf32, #tpu.memory_space<vmem>>, %arg15: memref<1x32xf32, #tpu.memory_space<vmem>>, %arg16: memref<1x32xf32, #tpu.memory_space<vmem>>, %arg17: memref<1x32xf32, #tpu.memory_space<vmem>>, %arg18: memref<1x32xf32, #tpu.memory_space<vmem>>, %arg19: memref<32x64xf32, #tpu.memory_space<vmem>>, %arg20: memref<1x64xf32, #tpu.memory_space<vmem>>, %arg21: memref<64x192xf32, #tpu.memory_space<vmem>>, %arg22: memref<1x192xf32, #tpu.memory_space<vmem>>, %arg23: memref<64x64xf32, #tpu.memory_space<vmem>>, %arg24: memref<1x64xf32, #tpu.memory_space<vmem>>, %arg25: memref<64x64xf32, #tpu.memory_space<vmem>>, %arg26: memref<1x64xf32, #tpu.memory_space<vmem>>, %arg27: memref<64x64xf32, #tpu.memory_space<vmem>>, %arg28: memref<1x64xf32, #tpu.memory_space<vmem>>, %arg29: memref<1x64xf32, #tpu.memory_space<vmem>>, %arg30: memref<1x64xf32, #tpu.memory_space<vmem>>, %arg31: memref<1x64xf32, #tpu.memory_space<vmem>>, %arg32: memref<1x64xf32, #tpu.memory_space<vmem>>, %arg33: memref<1x1x64xf32, #tpu.memory_space<vmem>>) attributes {dimension_semantics = [#tpu.dimension_semantics<parallel>], iteration_bounds = array<i64: 2>, scalar_prefetch = 1 : i64, scratch_operands = 0 : i64, tpu.core_type = #tpu.core_type<tc>, window_params = [{transform_indices = @transform_0, window_bounds = array<i64: 1, 1, 8>}, {pipeline_mode = #tpu.pipeline_mode<synchronous>, transform_indices = @transform_1, window_bounds = array<i64: 50, 1, 32>}, {pipeline_mode = #tpu.pipeline_mode<synchronous>, transform_indices = @transform_2, window_bounds = array<i64: 8, 32>}, {pipeline_mode = #tpu.pipeline_mode<synchronous>, transform_indices = @transform_3, window_bounds = array<i64: 32, 96>}, {pipeline_mode = #tpu.pipeline_mode<synchronous>, transform_indices = @transform_4, window_bounds = array<i64: 1, 96>}, {pipeline_mode = #tpu.pipeline_mode<synchronous>, transform_indices = @transform_5, window_bounds = array<i64: 32, 32>}, {pipeline_mode = #tpu.pipeline_mode<synchronous>, transform_indices = @transform_6, window_bounds = array<i64: 1, 32>}, {pipeline_mode = #tpu.pipeline_mode<synchronous>, transform_indices = @transform_7, window_bounds = array<i64: 32, 64>}, {pipeline_mode = #tpu.pipeline_mode<synchronous>, transform_indices = @transform_8, window_bounds = array<i64: 1, 64>}, {pipeline_mode = #tpu.pipeline_mode<synchronous>, transform_indices = @transform_9, window_bounds = array<i64: 64, 32>}, {pipeline_mode = #tpu.pipeline_mode<synchronous>, transform_indices = @transform_10, window_bounds = array<i64: 1, 32>}, {pipeline_mode = #tpu.pipeline_mode<synchronous>, transform_indices = @transform_11, window_bounds = array<i64: 1, 32>}, {pipeline_mode = #tpu.pipeline_mode<synchronous>, transform_indices = @transform_12, window_bounds = array<i64: 1, 32>}, {pipeline_mode = #tpu.pipeline_mode<synchronous>, transform_indices = @transform_13, window_bounds = array<i64: 1, 32>}, {pipeline_mode = #tpu.pipeline_mode<synchronous>, transform_indices = @transform_14, window_bounds = array<i64: 1, 32>}, {pipeline_mode = #tpu.pipeline_mode<synchronous>, transform_indices = @transform_15, window_bounds = array<i64: 1, 32>}, {pipeline_mode = #tpu.pipeline_mode<synchronous>, transform_indices = @transform_16, window_bounds = array<i64: 1, 32>}, {pipeline_mode = #tpu.pipeline_mode<synchronous>, transform_indices = @transform_17, window_bounds = array<i64: 32, 64>}, {pipeline_mode = #tpu.pipeline_mode<synchronous>, transform_indices = @transform_18, window_bounds = array<i64: 1, 64>}, {pipeline_mode = #tpu.pipeline_mode<synchronous>, transform_indices = @transform_19, window_bounds = array<i64: 64, 192>}, {pipeline_mode = #tpu.pipeline_mode<synchronous>, transform_indices = @transform_20, window_bounds = array<i64: 1, 192>}, {pipeline_mode = #tpu.pipeline_mode<synchronous>, transform_indices = @transform_21, window_bounds = array<i64: 64, 64>}, {pipeline_mode = #tpu.pipeline_mode<synchronous>, transform_indices = @transform_22, window_bounds = array<i64: 1, 64>}, {pipeline_mode = #tpu.pipeline_mode<synchronous>, transform_indices = @transform_23, window_bounds = array<i64: 64, 64>}, {pipeline_mode = #tpu.pipeline_mode<synchronous>, transform_indices = @transform_24, window_bounds = array<i64: 1, 64>}, {pipeline_mode = #tpu.pipeline_mode<synchronous>, transform_indices = @transform_25, window_bounds = array<i64: 64, 64>}, {pipeline_mode = #tpu.pipeline_mode<synchronous>, transform_indices = @transform_26, window_bounds = array<i64: 1, 64>}, {pipeline_mode = #tpu.pipeline_mode<synchronous>, transform_indices = @transform_27, window_bounds = array<i64: 1, 64>}, {pipeline_mode = #tpu.pipeline_mode<synchronous>, transform_indices = @transform_28, window_bounds = array<i64: 1, 64>}, {pipeline_mode = #tpu.pipeline_mode<synchronous>, transform_indices = @transform_29, window_bounds = array<i64: 1, 64>}, {pipeline_mode = #tpu.pipeline_mode<synchronous>, transform_indices = @transform_30, window_bounds = array<i64: 1, 64>}, {transform_indices = @transform_31, window_bounds = array<i64: 1, 1, 64>}]} {
    %0 = arith.index_cast %arg0 : i32 to index
    %c0 = arith.constant 0 : index
    %1 = memref.load %arg1[%0, %c0] : memref<2x8xi32, #tpu.memory_space<smem>>
    %2 = arith.index_cast %1 : i32 to index
    %c0_0 = arith.constant 0 : index
    %c0_1 = arith.constant 0 : index
    %3 = vector.load %arg3[%2, %c0_0, %c0_1] : memref<50x1x32xf32, #tpu.memory_space<vmem>>, vector<1x1x32xf32>
    %4 = vector.shape_cast %3 : vector<1x1x32xf32> to vector<1x32xf32>
    %5 = arith.index_cast %arg0 : i32 to index
    %c1 = arith.constant 1 : index
    %6 = memref.load %arg1[%5, %c1] : memref<2x8xi32, #tpu.memory_space<smem>>
    %7 = arith.index_cast %6 : i32 to index
    %c0_2 = arith.constant 0 : index
    %c0_3 = arith.constant 0 : index
    %8 = vector.load %arg3[%7, %c0_2, %c0_3] : memref<50x1x32xf32, #tpu.memory_space<vmem>>, vector<1x1x32xf32>
    %9 = vector.shape_cast %8 : vector<1x1x32xf32> to vector<1x32xf32>
    %10 = arith.index_cast %arg0 : i32 to index
    %c2 = arith.constant 2 : index
    %11 = memref.load %arg1[%10, %c2] : memref<2x8xi32, #tpu.memory_space<smem>>
    %12 = arith.index_cast %11 : i32 to index
    %c0_4 = arith.constant 0 : index
    %c0_5 = arith.constant 0 : index
    %13 = vector.load %arg3[%12, %c0_4, %c0_5] : memref<50x1x32xf32, #tpu.memory_space<vmem>>, vector<1x1x32xf32>
    %14 = vector.shape_cast %13 : vector<1x1x32xf32> to vector<1x32xf32>
    %15 = arith.index_cast %arg0 : i32 to index
    %c3 = arith.constant 3 : index
    %16 = memref.load %arg1[%15, %c3] : memref<2x8xi32, #tpu.memory_space<smem>>
    %17 = arith.index_cast %16 : i32 to index
    %c0_6 = arith.constant 0 : index
    %c0_7 = arith.constant 0 : index
    %18 = vector.load %arg3[%17, %c0_6, %c0_7] : memref<50x1x32xf32, #tpu.memory_space<vmem>>, vector<1x1x32xf32>
    %19 = vector.shape_cast %18 : vector<1x1x32xf32> to vector<1x32xf32>
    %20 = arith.index_cast %arg0 : i32 to index
    %c4 = arith.constant 4 : index
    %21 = memref.load %arg1[%20, %c4] : memref<2x8xi32, #tpu.memory_space<smem>>
    %22 = arith.index_cast %21 : i32 to index
    %c0_8 = arith.constant 0 : index
    %c0_9 = arith.constant 0 : index
    %23 = vector.load %arg3[%22, %c0_8, %c0_9] : memref<50x1x32xf32, #tpu.memory_space<vmem>>, vector<1x1x32xf32>
    %24 = vector.shape_cast %23 : vector<1x1x32xf32> to vector<1x32xf32>
    %25 = arith.index_cast %arg0 : i32 to index
    %c5 = arith.constant 5 : index
    %26 = memref.load %arg1[%25, %c5] : memref<2x8xi32, #tpu.memory_space<smem>>
    %27 = arith.index_cast %26 : i32 to index
    %c0_10 = arith.constant 0 : index
    %c0_11 = arith.constant 0 : index
    %28 = vector.load %arg3[%27, %c0_10, %c0_11] : memref<50x1x32xf32, #tpu.memory_space<vmem>>, vector<1x1x32xf32>
    %29 = vector.shape_cast %28 : vector<1x1x32xf32> to vector<1x32xf32>
    %30 = arith.index_cast %arg0 : i32 to index
    %c6 = arith.constant 6 : index
    %31 = memref.load %arg1[%30, %c6] : memref<2x8xi32, #tpu.memory_space<smem>>
    %32 = arith.index_cast %31 : i32 to index
    %c0_12 = arith.constant 0 : index
    %c0_13 = arith.constant 0 : index
    %33 = vector.load %arg3[%32, %c0_12, %c0_13] : memref<50x1x32xf32, #tpu.memory_space<vmem>>, vector<1x1x32xf32>
    %34 = vector.shape_cast %33 : vector<1x1x32xf32> to vector<1x32xf32>
    %35 = arith.index_cast %arg0 : i32 to index
    %c7 = arith.constant 7 : index
    %36 = memref.load %arg1[%35, %c7] : memref<2x8xi32, #tpu.memory_space<smem>>
    %37 = arith.index_cast %36 : i32 to index
    %c0_14 = arith.constant 0 : index
    %c0_15 = arith.constant 0 : index
    %38 = vector.load %arg3[%37, %c0_14, %c0_15] : memref<50x1x32xf32, #tpu.memory_space<vmem>>, vector<1x1x32xf32>
    %39 = vector.shape_cast %38 : vector<1x1x32xf32> to vector<1x32xf32>
    %40 = tpu.concatenate %4, %9, %14, %19, %24, %29, %34, %39 in 0 : vector<1x32xf32>, vector<1x32xf32>, vector<1x32xf32>, vector<1x32xf32>, vector<1x32xf32>, vector<1x32xf32>, vector<1x32xf32>, vector<1x32xf32> -> vector<8x32xf32>
    %c0_16 = arith.constant 0 : index
    %c0_17 = arith.constant 0 : index
    %41 = vector.load %arg4[%c0_16, %c0_17] : memref<8x32xf32, #tpu.memory_space<vmem>>, vector<8x32xf32>
    %42 = arith.addf %40, %41 : vector<8x32xf32>
    %c0_18 = arith.constant 0 : index
    %c0_19 = arith.constant 0 : index
    %c0_20 = arith.constant 0 : index
    %43 = vector.load %arg2[%c0_18, %c0_19, %c0_20] : memref<1x1x8xf32, #tpu.memory_space<vmem>>, vector<1x1x8xf32>
    %c0_21 = arith.constant 0 : index
    %c0_22 = arith.constant 0 : index
    %c0_23 = arith.constant 0 : index
    %44 = vector.load %arg2[%c0_21, %c0_22, %c0_23] : memref<1x1x8xf32, #tpu.memory_space<vmem>>, vector<1x1x8xf32>
    %45 = vector.shape_cast %44 : vector<1x1x8xf32> to vector<1x8xf32>
    %c0_24 = arith.constant 0 : index
    %c0_25 = arith.constant 0 : index
    %46 = vector.load %arg5[%c0_24, %c0_25] : memref<32x96xf32, #tpu.memory_space<vmem>>, vector<32x96xf32>
    %c0_26 = arith.constant 0 : index
    %c0_27 = arith.constant 0 : index
    %47 = vector.load %arg6[%c0_26, %c0_27] : memref<1x96xf32, #tpu.memory_space<vmem>>, vector<1x96xf32>
    %c0_28 = arith.constant 0 : index
    %c0_29 = arith.constant 0 : index
    %48 = vector.load %arg7[%c0_28, %c0_29] : memref<32x32xf32, #tpu.memory_space<vmem>>, vector<32x32xf32>
    %c0_30 = arith.constant 0 : index
    %c0_31 = arith.constant 0 : index
    %49 = vector.load %arg8[%c0_30, %c0_31] : memref<1x32xf32, #tpu.memory_space<vmem>>, vector<1x32xf32>
    %c0_32 = arith.constant 0 : index
    %c0_33 = arith.constant 0 : index
    %50 = vector.load %arg9[%c0_32, %c0_33] : memref<32x64xf32, #tpu.memory_space<vmem>>, vector<32x64xf32>
    %c0_34 = arith.constant 0 : index
    %c0_35 = arith.constant 0 : index
    %51 = vector.load %arg10[%c0_34, %c0_35] : memref<1x64xf32, #tpu.memory_space<vmem>>, vector<1x64xf32>
    %c0_36 = arith.constant 0 : index
    %c0_37 = arith.constant 0 : index
    %52 = vector.load %arg11[%c0_36, %c0_37] : memref<64x32xf32, #tpu.memory_space<vmem>>, vector<64x32xf32>
    %c0_38 = arith.constant 0 : index
    %c0_39 = arith.constant 0 : index
    %53 = vector.load %arg12[%c0_38, %c0_39] : memref<1x32xf32, #tpu.memory_space<vmem>>, vector<1x32xf32>
    %c0_40 = arith.constant 0 : index
    %c0_41 = arith.constant 0 : index
    %54 = vector.load %arg13[%c0_40, %c0_41] : memref<1x32xf32, #tpu.memory_space<vmem>>, vector<1x32xf32>
    %c0_42 = arith.constant 0 : index
    %c0_43 = arith.constant 0 : index
    %55 = vector.load %arg14[%c0_42, %c0_43] : memref<1x32xf32, #tpu.memory_space<vmem>>, vector<1x32xf32>
    %c0_44 = arith.constant 0 : index
    %c0_45 = arith.constant 0 : index
    %56 = vector.load %arg15[%c0_44, %c0_45] : memref<1x32xf32, #tpu.memory_space<vmem>>, vector<1x32xf32>
    %c0_46 = arith.constant 0 : index
    %c0_47 = arith.constant 0 : index
    %57 = vector.load %arg16[%c0_46, %c0_47] : memref<1x32xf32, #tpu.memory_space<vmem>>, vector<1x32xf32>
    %cst = arith.constant dense<0.000000e+00> : vector<8x96xf32>
    %58 = tpu.matmul %42, %46, %cst {dimension_numbers = #tpu.dot_dimension_numbers<[1], [0], [0], [1], [0, 0, 1, 1], [], []>} : vector<8x32xf32>, vector<32x96xf32>, vector<8x96xf32> -> vector<8x96xf32>
    %59 = vector.broadcast %47 : vector<1x96xf32> to vector<8x96xf32>
    %60 = arith.addf %58, %59 : vector<8x96xf32>
    %61 = vector.extract_strided_slice %60 {offsets = [0, 0], sizes = [8, 32], strides = [1, 1]} : vector<8x96xf32> to vector<8x32xf32>
    %62 = vector.extract_strided_slice %60 {offsets = [0, 32], sizes = [8, 32], strides = [1, 1]} : vector<8x96xf32> to vector<8x32xf32>
    %63 = vector.extract_strided_slice %60 {offsets = [0, 64], sizes = [8, 32], strides = [1, 1]} : vector<8x96xf32> to vector<8x32xf32>
    %64 = vector.shape_cast %61 : vector<8x32xf32> to vector<1x8x32xf32>
    %65 = vector.shape_cast %62 : vector<8x32xf32> to vector<1x8x32xf32>
    %66 = vector.shape_cast %63 : vector<8x32xf32> to vector<1x8x32xf32>
    "tpu.trace_start"() <{level = 10 : i32, message = "hqd,hkd->hqk"}> : () -> ()
    %cst_48 = arith.constant dense<0.000000e+00> : vector<1x8x8xf32>
    %67 = tpu.matmul %64, %65, %cst_48 {dimension_numbers = #tpu.dot_dimension_numbers<[2], [2], [1], [1], [0, 0, 0, 1, 1, 1], [0], [0]>} : vector<1x8x32xf32>, vector<1x8x32xf32>, vector<1x8x8xf32> -> vector<1x8x8xf32>
    %cst_49 = arith.constant 5.000000e-01 : f32
    "tpu.trace_stop"() : () -> ()
    %68 = vector.broadcast %cst_49 : f32 to vector<1x1x8xf32>
    %69 = arith.cmpf ogt, %43, %68 : vector<1x1x8xf32>
    %cst_50 = arith.constant -1.000000e+30 : f32
    %70 = vector.shape_cast %69 : vector<1x1x8xi1> to vector<1x1x8xi1>
    %71 = vector.broadcast %70 : vector<1x1x8xi1> to vector<1x8x8xi1>
    %72 = vector.broadcast %cst_50 : f32 to vector<1x8x8xf32>
    %73 = arith.select %71, %67, %72 : vector<1x8x8xi1>, vector<1x8x8xf32>
    %cst_51 = arith.constant dense<0xFF800000> : vector<1x8xf32>
    %74 = vector.multi_reduction <maximumf>, %73, %cst_51 [2] : vector<1x8x8xf32> to vector<1x8xf32>
    %75 = vector.shape_cast %74 : vector<1x8xf32> to vector<1x8x1xf32>
    %76 = vector.broadcast %75 : vector<1x8x1xf32> to vector<1x8x8xf32>
    %77 = arith.subf %73, %76 : vector<1x8x8xf32>
    %78 = math.exp %77 : vector<1x8x8xf32>
    %cst_52 = arith.constant dense<0.000000e+00> : vector<1x8xf32>
    %79 = vector.multi_reduction <add>, %78, %cst_52 [2] : vector<1x8x8xf32> to vector<1x8xf32>
    %80 = vector.shape_cast %79 : vector<1x8xf32> to vector<1x8x1xf32>
    %81 = tpu.reciprocal %80 {approx = true} : vector<1x8x1xf32> -> vector<1x8x1xf32>
    %82 = vector.broadcast %81 : vector<1x8x1xf32> to vector<1x8x8xf32>
    %83 = arith.mulf %78, %82 : vector<1x8x8xf32>
    "tpu.trace_start"() <{level = 10 : i32, message = "hqk,hkd->hqd"}> : () -> ()
    %cst_53 = arith.constant dense<0.000000e+00> : vector<1x8x32xf32>
    %84 = tpu.matmul %83, %66, %cst_53 {dimension_numbers = #tpu.dot_dimension_numbers<[2], [1], [1], [2], [0, 0, 0, 1, 1, 2], [0], [0]>} : vector<1x8x8xf32>, vector<1x8x32xf32>, vector<1x8x32xf32> -> vector<1x8x32xf32>
    "tpu.trace_stop"() : () -> ()
    %85 = vector.shape_cast %84 : vector<1x8x32xf32> to vector<8x32xf32>
    %cst_54 = arith.constant dense<0.000000e+00> : vector<8x32xf32>
    %86 = tpu.matmul %85, %48, %cst_54 {dimension_numbers = #tpu.dot_dimension_numbers<[1], [0], [0], [1], [0, 0, 1, 1], [], []>} : vector<8x32xf32>, vector<32x32xf32>, vector<8x32xf32> -> vector<8x32xf32>
    %87 = vector.broadcast %49 : vector<1x32xf32> to vector<8x32xf32>
    %88 = arith.addf %86, %87 : vector<8x32xf32>
    %89 = arith.addf %42, %88 : vector<8x32xf32>
    %cst_55 = arith.constant dense<0.000000e+00> : vector<8xf32>
    %90 = vector.multi_reduction <add>, %89, %cst_55 [1] : vector<8x32xf32> to vector<8xf32>
    %91 = vector.shape_cast %90 : vector<8xf32> to vector<8x1xf32>
    %cst_56 = arith.constant 3.200000e+01 : f32
    %92 = vector.broadcast %cst_56 : f32 to vector<8x1xf32>
    %93 = arith.divf %91, %92 : vector<8x1xf32>
    %94 = vector.broadcast %93 : vector<8x1xf32> to vector<8x32xf32>
    %95 = arith.subf %89, %94 : vector<8x32xf32>
    %96 = arith.mulf %95, %95 : vector<8x32xf32>
    %cst_57 = arith.constant dense<0.000000e+00> : vector<8xf32>
    %97 = vector.multi_reduction <add>, %96, %cst_57 [1] : vector<8x32xf32> to vector<8xf32>
    %98 = vector.shape_cast %97 : vector<8xf32> to vector<8x1xf32>
    %cst_58 = arith.constant 3.200000e+01 : f32
    %99 = vector.broadcast %cst_58 : f32 to vector<8x1xf32>
    %100 = arith.divf %98, %99 : vector<8x1xf32>
    %101 = vector.broadcast %93 : vector<8x1xf32> to vector<8x32xf32>
    %102 = arith.subf %89, %101 : vector<8x32xf32>
    %cst_59 = arith.constant 9.99999974E-6 : f32
    %103 = vector.broadcast %cst_59 : f32 to vector<8x1xf32>
    %104 = arith.addf %100, %103 : vector<8x1xf32>
    %105 = math.rsqrt %104 : vector<8x1xf32>
    %106 = vector.broadcast %105 : vector<8x1xf32> to vector<8x32xf32>
    %107 = arith.mulf %102, %106 : vector<8x32xf32>
    %108 = vector.broadcast %54 : vector<1x32xf32> to vector<8x32xf32>
    %109 = arith.mulf %107, %108 : vector<8x32xf32>
    %110 = vector.broadcast %55 : vector<1x32xf32> to vector<8x32xf32>
    %111 = arith.addf %109, %110 : vector<8x32xf32>
    %cst_60 = arith.constant dense<0.000000e+00> : vector<8x64xf32>
    %112 = tpu.matmul %111, %50, %cst_60 {dimension_numbers = #tpu.dot_dimension_numbers<[1], [0], [0], [1], [0, 0, 1, 1], [], []>} : vector<8x32xf32>, vector<32x64xf32>, vector<8x64xf32> -> vector<8x64xf32>
    %113 = vector.broadcast %51 : vector<1x64xf32> to vector<8x64xf32>
    %114 = arith.addf %112, %113 : vector<8x64xf32>
    %cst_61 = arith.constant 0.000000e+00 : f32
    %115 = vector.broadcast %cst_61 : f32 to vector<8x64xf32>
    %116 = arith.maximumf %114, %115 : vector<8x64xf32>
    %cst_62 = arith.constant dense<0.000000e+00> : vector<8x32xf32>
    %117 = tpu.matmul %116, %52, %cst_62 {dimension_numbers = #tpu.dot_dimension_numbers<[1], [0], [0], [1], [0, 0, 1, 1], [], []>} : vector<8x64xf32>, vector<64x32xf32>, vector<8x32xf32> -> vector<8x32xf32>
    %118 = vector.broadcast %53 : vector<1x32xf32> to vector<8x32xf32>
    %119 = arith.addf %117, %118 : vector<8x32xf32>
    %120 = arith.addf %111, %119 : vector<8x32xf32>
    %cst_63 = arith.constant dense<0.000000e+00> : vector<8xf32>
    %121 = vector.multi_reduction <add>, %120, %cst_63 [1] : vector<8x32xf32> to vector<8xf32>
    %122 = vector.shape_cast %121 : vector<8xf32> to vector<8x1xf32>
    %cst_64 = arith.constant 3.200000e+01 : f32
    %123 = vector.broadcast %cst_64 : f32 to vector<8x1xf32>
    %124 = arith.divf %122, %123 : vector<8x1xf32>
    %125 = vector.broadcast %124 : vector<8x1xf32> to vector<8x32xf32>
    %126 = arith.subf %120, %125 : vector<8x32xf32>
    %127 = arith.mulf %126, %126 : vector<8x32xf32>
    %cst_65 = arith.constant dense<0.000000e+00> : vector<8xf32>
    %128 = vector.multi_reduction <add>, %127, %cst_65 [1] : vector<8x32xf32> to vector<8xf32>
    %129 = vector.shape_cast %128 : vector<8xf32> to vector<8x1xf32>
    %cst_66 = arith.constant 3.200000e+01 : f32
    %130 = vector.broadcast %cst_66 : f32 to vector<8x1xf32>
    %131 = arith.divf %129, %130 : vector<8x1xf32>
    %132 = vector.broadcast %124 : vector<8x1xf32> to vector<8x32xf32>
    %133 = arith.subf %120, %132 : vector<8x32xf32>
    %cst_67 = arith.constant 9.99999974E-6 : f32
    %134 = vector.broadcast %cst_67 : f32 to vector<8x1xf32>
    %135 = arith.addf %131, %134 : vector<8x1xf32>
    %136 = math.rsqrt %135 : vector<8x1xf32>
    %137 = vector.broadcast %136 : vector<8x1xf32> to vector<8x32xf32>
    %138 = arith.mulf %133, %137 : vector<8x32xf32>
    %139 = vector.broadcast %56 : vector<1x32xf32> to vector<8x32xf32>
    %140 = arith.mulf %138, %139 : vector<8x32xf32>
    %141 = vector.broadcast %57 : vector<1x32xf32> to vector<8x32xf32>
    %142 = arith.addf %140, %141 : vector<8x32xf32>
    %c0_68 = arith.constant 0 : index
    %c0_69 = arith.constant 0 : index
    %143 = vector.load %arg17[%c0_68, %c0_69] : memref<1x32xf32, #tpu.memory_space<vmem>>, vector<1x32xf32>
    %c0_70 = arith.constant 0 : index
    %c0_71 = arith.constant 0 : index
    %144 = vector.load %arg18[%c0_70, %c0_71] : memref<1x32xf32, #tpu.memory_space<vmem>>, vector<1x32xf32>
    %cst_72 = arith.constant dense<0.000000e+00> : vector<8xf32>
    %145 = vector.multi_reduction <add>, %142, %cst_72 [1] : vector<8x32xf32> to vector<8xf32>
    %146 = vector.shape_cast %145 : vector<8xf32> to vector<8x1xf32>
    %cst_73 = arith.constant 3.200000e+01 : f32
    %147 = vector.broadcast %cst_73 : f32 to vector<8x1xf32>
    %148 = arith.divf %146, %147 : vector<8x1xf32>
    %149 = vector.broadcast %148 : vector<8x1xf32> to vector<8x32xf32>
    %150 = arith.subf %142, %149 : vector<8x32xf32>
    %151 = arith.mulf %150, %150 : vector<8x32xf32>
    %cst_74 = arith.constant dense<0.000000e+00> : vector<8xf32>
    %152 = vector.multi_reduction <add>, %151, %cst_74 [1] : vector<8x32xf32> to vector<8xf32>
    %153 = vector.shape_cast %152 : vector<8xf32> to vector<8x1xf32>
    %cst_75 = arith.constant 3.200000e+01 : f32
    %154 = vector.broadcast %cst_75 : f32 to vector<8x1xf32>
    %155 = arith.divf %153, %154 : vector<8x1xf32>
    %156 = vector.broadcast %148 : vector<8x1xf32> to vector<8x32xf32>
    %157 = arith.subf %142, %156 : vector<8x32xf32>
    %cst_76 = arith.constant 9.99999974E-6 : f32
    %158 = vector.broadcast %cst_76 : f32 to vector<8x1xf32>
    %159 = arith.addf %155, %158 : vector<8x1xf32>
    %160 = math.rsqrt %159 : vector<8x1xf32>
    %161 = vector.broadcast %160 : vector<8x1xf32> to vector<8x32xf32>
    %162 = arith.mulf %157, %161 : vector<8x32xf32>
    %163 = vector.broadcast %143 : vector<1x32xf32> to vector<8x32xf32>
    %164 = arith.mulf %162, %163 : vector<8x32xf32>
    %165 = vector.broadcast %144 : vector<1x32xf32> to vector<8x32xf32>
    %166 = arith.addf %164, %165 : vector<8x32xf32>
    %c0_77 = arith.constant 0 : index
    %c0_78 = arith.constant 0 : index
    %167 = vector.load %arg19[%c0_77, %c0_78] : memref<32x64xf32, #tpu.memory_space<vmem>>, vector<32x64xf32>
    %cst_79 = arith.constant dense<0.000000e+00> : vector<8x64xf32>
    %168 = tpu.matmul %166, %167, %cst_79 {dimension_numbers = #tpu.dot_dimension_numbers<[1], [0], [0], [1], [0, 0, 1, 1], [], []>} : vector<8x32xf32>, vector<32x64xf32>, vector<8x64xf32> -> vector<8x64xf32>
    %c0_80 = arith.constant 0 : index
    %c0_81 = arith.constant 0 : index
    %169 = vector.load %arg20[%c0_80, %c0_81] : memref<1x64xf32, #tpu.memory_space<vmem>>, vector<1x64xf32>
    %170 = vector.broadcast %169 : vector<1x64xf32> to vector<8x64xf32>
    %171 = arith.addf %168, %170 : vector<8x64xf32>
    %c0_82 = arith.constant 0 : index
    %c0_83 = arith.constant 0 : index
    %172 = vector.load %arg21[%c0_82, %c0_83] : memref<64x192xf32, #tpu.memory_space<vmem>>, vector<64x192xf32>
    %c0_84 = arith.constant 0 : index
    %c0_85 = arith.constant 0 : index
    %173 = vector.load %arg22[%c0_84, %c0_85] : memref<1x192xf32, #tpu.memory_space<vmem>>, vector<1x192xf32>
    %c0_86 = arith.constant 0 : index
    %c0_87 = arith.constant 0 : index
    %174 = vector.load %arg23[%c0_86, %c0_87] : memref<64x64xf32, #tpu.memory_space<vmem>>, vector<64x64xf32>
    %c0_88 = arith.constant 0 : index
    %c0_89 = arith.constant 0 : index
    %175 = vector.load %arg24[%c0_88, %c0_89] : memref<1x64xf32, #tpu.memory_space<vmem>>, vector<1x64xf32>
    %c0_90 = arith.constant 0 : index
    %c0_91 = arith.constant 0 : index
    %176 = vector.load %arg25[%c0_90, %c0_91] : memref<64x64xf32, #tpu.memory_space<vmem>>, vector<64x64xf32>
    %c0_92 = arith.constant 0 : index
    %c0_93 = arith.constant 0 : index
    %177 = vector.load %arg26[%c0_92, %c0_93] : memref<1x64xf32, #tpu.memory_space<vmem>>, vector<1x64xf32>
    %c0_94 = arith.constant 0 : index
    %c0_95 = arith.constant 0 : index
    %178 = vector.load %arg27[%c0_94, %c0_95] : memref<64x64xf32, #tpu.memory_space<vmem>>, vector<64x64xf32>
    %c0_96 = arith.constant 0 : index
    %c0_97 = arith.constant 0 : index
    %179 = vector.load %arg28[%c0_96, %c0_97] : memref<1x64xf32, #tpu.memory_space<vmem>>, vector<1x64xf32>
    %c0_98 = arith.constant 0 : index
    %c0_99 = arith.constant 0 : index
    %180 = vector.load %arg29[%c0_98, %c0_99] : memref<1x64xf32, #tpu.memory_space<vmem>>, vector<1x64xf32>
    %c0_100 = arith.constant 0 : index
    %c0_101 = arith.constant 0 : index
    %181 = vector.load %arg30[%c0_100, %c0_101] : memref<1x64xf32, #tpu.memory_space<vmem>>, vector<1x64xf32>
    %c0_102 = arith.constant 0 : index
    %c0_103 = arith.constant 0 : index
    %182 = vector.load %arg31[%c0_102, %c0_103] : memref<1x64xf32, #tpu.memory_space<vmem>>, vector<1x64xf32>
    %c0_104 = arith.constant 0 : index
    %c0_105 = arith.constant 0 : index
    %183 = vector.load %arg32[%c0_104, %c0_105] : memref<1x64xf32, #tpu.memory_space<vmem>>, vector<1x64xf32>
    %cst_106 = arith.constant dense<0.000000e+00> : vector<8x192xf32>
    %184 = tpu.matmul %171, %172, %cst_106 {dimension_numbers = #tpu.dot_dimension_numbers<[1], [0], [0], [1], [0, 0, 1, 1], [], []>} : vector<8x64xf32>, vector<64x192xf32>, vector<8x192xf32> -> vector<8x192xf32>
    %185 = vector.broadcast %173 : vector<1x192xf32> to vector<8x192xf32>
    %186 = arith.addf %184, %185 : vector<8x192xf32>
    %187 = vector.extract_strided_slice %186 {offsets = [0, 0], sizes = [8, 64], strides = [1, 1]} : vector<8x192xf32> to vector<8x64xf32>
    %188 = vector.extract_strided_slice %186 {offsets = [0, 64], sizes = [8, 64], strides = [1, 1]} : vector<8x192xf32> to vector<8x64xf32>
    %189 = vector.extract_strided_slice %186 {offsets = [0, 128], sizes = [8, 64], strides = [1, 1]} : vector<8x192xf32> to vector<8x64xf32>
    %190 = vector.extract_strided_slice %187 {offsets = [0, 0], sizes = [8, 32], strides = [1, 1]} : vector<8x64xf32> to vector<8x32xf32>
    %191 = vector.extract_strided_slice %187 {offsets = [0, 32], sizes = [8, 32], strides = [1, 1]} : vector<8x64xf32> to vector<8x32xf32>
    %192 = vector.shape_cast %190 : vector<8x32xf32> to vector<1x8x32xf32>
    %193 = vector.shape_cast %191 : vector<8x32xf32> to vector<1x8x32xf32>
    %194 = tpu.concatenate %192, %193 in 0 : vector<1x8x32xf32>, vector<1x8x32xf32> -> vector<2x8x32xf32>
    %195 = vector.extract_strided_slice %188 {offsets = [0, 0], sizes = [8, 32], strides = [1, 1]} : vector<8x64xf32> to vector<8x32xf32>
    %196 = vector.extract_strided_slice %188 {offsets = [0, 32], sizes = [8, 32], strides = [1, 1]} : vector<8x64xf32> to vector<8x32xf32>
    %197 = vector.shape_cast %195 : vector<8x32xf32> to vector<1x8x32xf32>
    %198 = vector.shape_cast %196 : vector<8x32xf32> to vector<1x8x32xf32>
    %199 = tpu.concatenate %197, %198 in 0 : vector<1x8x32xf32>, vector<1x8x32xf32> -> vector<2x8x32xf32>
    %200 = vector.extract_strided_slice %189 {offsets = [0, 0], sizes = [8, 32], strides = [1, 1]} : vector<8x64xf32> to vector<8x32xf32>
    %201 = vector.extract_strided_slice %189 {offsets = [0, 32], sizes = [8, 32], strides = [1, 1]} : vector<8x64xf32> to vector<8x32xf32>
    %202 = vector.shape_cast %200 : vector<8x32xf32> to vector<1x8x32xf32>
    %203 = vector.shape_cast %201 : vector<8x32xf32> to vector<1x8x32xf32>
    %204 = tpu.concatenate %202, %203 in 0 : vector<1x8x32xf32>, vector<1x8x32xf32> -> vector<2x8x32xf32>
    "tpu.trace_start"() <{level = 10 : i32, message = "hqd,hkd->hqk"}> : () -> ()
    %cst_107 = arith.constant dense<0.000000e+00> : vector<2x8x8xf32>
    %205 = tpu.matmul %194, %199, %cst_107 {dimension_numbers = #tpu.dot_dimension_numbers<[2], [2], [1], [1], [0, 0, 0, 1, 1, 1], [0], [0]>} : vector<2x8x32xf32>, vector<2x8x32xf32>, vector<2x8x8xf32> -> vector<2x8x8xf32>
    %cst_108 = arith.constant 5.000000e-01 : f32
    "tpu.trace_stop"() : () -> ()
    %206 = vector.broadcast %cst_108 : f32 to vector<1x1x8xf32>
    %207 = arith.cmpf ogt, %43, %206 : vector<1x1x8xf32>
    %cst_109 = arith.constant -1.000000e+30 : f32
    %208 = vector.shape_cast %207 : vector<1x1x8xi1> to vector<1x1x8xi1>
    %209 = vector.broadcast %208 : vector<1x1x8xi1> to vector<2x8x8xi1>
    %210 = vector.broadcast %cst_109 : f32 to vector<2x8x8xf32>
    %211 = arith.select %209, %205, %210 : vector<2x8x8xi1>, vector<2x8x8xf32>
    %cst_110 = arith.constant dense<0xFF800000> : vector<2x8xf32>
    %212 = vector.multi_reduction <maximumf>, %211, %cst_110 [2] : vector<2x8x8xf32> to vector<2x8xf32>
    %213 = vector.shape_cast %212 : vector<2x8xf32> to vector<2x8x1xf32>
    %214 = vector.broadcast %213 : vector<2x8x1xf32> to vector<2x8x8xf32>
    %215 = arith.subf %211, %214 : vector<2x8x8xf32>
    %216 = math.exp %215 : vector<2x8x8xf32>
    %cst_111 = arith.constant dense<0.000000e+00> : vector<2x8xf32>
    %217 = vector.multi_reduction <add>, %216, %cst_111 [2] : vector<2x8x8xf32> to vector<2x8xf32>
    %218 = vector.shape_cast %217 : vector<2x8xf32> to vector<2x8x1xf32>
    %219 = tpu.reciprocal %218 {approx = true} : vector<2x8x1xf32> -> vector<2x8x1xf32>
    %220 = vector.broadcast %219 : vector<2x8x1xf32> to vector<2x8x8xf32>
    %221 = arith.mulf %216, %220 : vector<2x8x8xf32>
    "tpu.trace_start"() <{level = 10 : i32, message = "hqk,hkd->hqd"}> : () -> ()
    %cst_112 = arith.constant dense<0.000000e+00> : vector<2x8x32xf32>
    %222 = tpu.matmul %221, %204, %cst_112 {dimension_numbers = #tpu.dot_dimension_numbers<[2], [1], [1], [2], [0, 0, 0, 1, 1, 2], [0], [0]>} : vector<2x8x8xf32>, vector<2x8x32xf32>, vector<2x8x32xf32> -> vector<2x8x32xf32>
    "tpu.trace_stop"() : () -> ()
    %223 = vector.extract_strided_slice %222 {offsets = [0, 0, 0], sizes = [1, 8, 32], strides = [1, 1, 1]} : vector<2x8x32xf32> to vector<1x8x32xf32>
    %224 = vector.shape_cast %223 : vector<1x8x32xf32> to vector<8x32xf32>
    %225 = vector.extract_strided_slice %222 {offsets = [1, 0, 0], sizes = [1, 8, 32], strides = [1, 1, 1]} : vector<2x8x32xf32> to vector<1x8x32xf32>
    %226 = vector.shape_cast %225 : vector<1x8x32xf32> to vector<8x32xf32>
    %227 = tpu.concatenate %224, %226 in 1 : vector<8x32xf32>, vector<8x32xf32> -> vector<8x64xf32>
    %cst_113 = arith.constant dense<0.000000e+00> : vector<8x64xf32>
    %228 = tpu.matmul %227, %174, %cst_113 {dimension_numbers = #tpu.dot_dimension_numbers<[1], [0], [0], [1], [0, 0, 1, 1], [], []>} : vector<8x64xf32>, vector<64x64xf32>, vector<8x64xf32> -> vector<8x64xf32>
    %229 = vector.broadcast %175 : vector<1x64xf32> to vector<8x64xf32>
    %230 = arith.addf %228, %229 : vector<8x64xf32>
    %231 = arith.addf %171, %230 : vector<8x64xf32>
    %cst_114 = arith.constant dense<0.000000e+00> : vector<8xf32>
    %232 = vector.multi_reduction <add>, %231, %cst_114 [1] : vector<8x64xf32> to vector<8xf32>
    %233 = vector.shape_cast %232 : vector<8xf32> to vector<8x1xf32>
    %cst_115 = arith.constant 6.400000e+01 : f32
    %234 = vector.broadcast %cst_115 : f32 to vector<8x1xf32>
    %235 = arith.divf %233, %234 : vector<8x1xf32>
    %236 = vector.broadcast %235 : vector<8x1xf32> to vector<8x64xf32>
    %237 = arith.subf %231, %236 : vector<8x64xf32>
    %238 = arith.mulf %237, %237 : vector<8x64xf32>
    %cst_116 = arith.constant dense<0.000000e+00> : vector<8xf32>
    %239 = vector.multi_reduction <add>, %238, %cst_116 [1] : vector<8x64xf32> to vector<8xf32>
    %240 = vector.shape_cast %239 : vector<8xf32> to vector<8x1xf32>
    %cst_117 = arith.constant 6.400000e+01 : f32
    %241 = vector.broadcast %cst_117 : f32 to vector<8x1xf32>
    %242 = arith.divf %240, %241 : vector<8x1xf32>
    %243 = vector.broadcast %235 : vector<8x1xf32> to vector<8x64xf32>
    %244 = arith.subf %231, %243 : vector<8x64xf32>
    %cst_118 = arith.constant 9.99999974E-6 : f32
    %245 = vector.broadcast %cst_118 : f32 to vector<8x1xf32>
    %246 = arith.addf %242, %245 : vector<8x1xf32>
    %247 = math.rsqrt %246 : vector<8x1xf32>
    %248 = vector.broadcast %247 : vector<8x1xf32> to vector<8x64xf32>
    %249 = arith.mulf %244, %248 : vector<8x64xf32>
    %250 = vector.broadcast %180 : vector<1x64xf32> to vector<8x64xf32>
    %251 = arith.mulf %249, %250 : vector<8x64xf32>
    %252 = vector.broadcast %181 : vector<1x64xf32> to vector<8x64xf32>
    %253 = arith.addf %251, %252 : vector<8x64xf32>
    %cst_119 = arith.constant dense<0.000000e+00> : vector<8x64xf32>
    %254 = tpu.matmul %253, %176, %cst_119 {dimension_numbers = #tpu.dot_dimension_numbers<[1], [0], [0], [1], [0, 0, 1, 1], [], []>} : vector<8x64xf32>, vector<64x64xf32>, vector<8x64xf32> -> vector<8x64xf32>
    %255 = vector.broadcast %177 : vector<1x64xf32> to vector<8x64xf32>
    %256 = arith.addf %254, %255 : vector<8x64xf32>
    %cst_120 = arith.constant 0.000000e+00 : f32
    %257 = vector.broadcast %cst_120 : f32 to vector<8x64xf32>
    %258 = arith.maximumf %256, %257 : vector<8x64xf32>
    %cst_121 = arith.constant dense<0.000000e+00> : vector<8x64xf32>
    %259 = tpu.matmul %258, %178, %cst_121 {dimension_numbers = #tpu.dot_dimension_numbers<[1], [0], [0], [1], [0, 0, 1, 1], [], []>} : vector<8x64xf32>, vector<64x64xf32>, vector<8x64xf32> -> vector<8x64xf32>
    %260 = vector.broadcast %179 : vector<1x64xf32> to vector<8x64xf32>
    %261 = arith.addf %259, %260 : vector<8x64xf32>
    %262 = arith.addf %253, %261 : vector<8x64xf32>
    %cst_122 = arith.constant dense<0.000000e+00> : vector<8xf32>
    %263 = vector.multi_reduction <add>, %262, %cst_122 [1] : vector<8x64xf32> to vector<8xf32>
    %264 = vector.shape_cast %263 : vector<8xf32> to vector<8x1xf32>
    %cst_123 = arith.constant 6.400000e+01 : f32
    %265 = vector.broadcast %cst_123 : f32 to vector<8x1xf32>
    %266 = arith.divf %264, %265 : vector<8x1xf32>
    %267 = vector.broadcast %266 : vector<8x1xf32> to vector<8x64xf32>
    %268 = arith.subf %262, %267 : vector<8x64xf32>
    %269 = arith.mulf %268, %268 : vector<8x64xf32>
    %cst_124 = arith.constant dense<0.000000e+00> : vector<8xf32>
    %270 = vector.multi_reduction <add>, %269, %cst_124 [1] : vector<8x64xf32> to vector<8xf32>
    %271 = vector.shape_cast %270 : vector<8xf32> to vector<8x1xf32>
    %cst_125 = arith.constant 6.400000e+01 : f32
    %272 = vector.broadcast %cst_125 : f32 to vector<8x1xf32>
    %273 = arith.divf %271, %272 : vector<8x1xf32>
    %274 = vector.broadcast %266 : vector<8x1xf32> to vector<8x64xf32>
    %275 = arith.subf %262, %274 : vector<8x64xf32>
    %cst_126 = arith.constant 9.99999974E-6 : f32
    %276 = vector.broadcast %cst_126 : f32 to vector<8x1xf32>
    %277 = arith.addf %273, %276 : vector<8x1xf32>
    %278 = math.rsqrt %277 : vector<8x1xf32>
    %279 = vector.broadcast %278 : vector<8x1xf32> to vector<8x64xf32>
    %280 = arith.mulf %275, %279 : vector<8x64xf32>
    %281 = vector.broadcast %182 : vector<1x64xf32> to vector<8x64xf32>
    %282 = arith.mulf %280, %281 : vector<8x64xf32>
    %283 = vector.broadcast %183 : vector<1x64xf32> to vector<8x64xf32>
    %284 = arith.addf %282, %283 : vector<8x64xf32>
    %cst_127 = arith.constant dense<0.000000e+00> : vector<1x64xf32>
    %285 = tpu.matmul %45, %284, %cst_127 {dimension_numbers = #tpu.dot_dimension_numbers<[1], [0], [0], [1], [0, 0, 1, 1], [], []>} : vector<1x8xf32>, vector<8x64xf32>, vector<1x64xf32> -> vector<1x64xf32>
    %cst_128 = arith.constant dense<0.000000e+00> : vector<1xf32>
    %286 = vector.multi_reduction <add>, %45, %cst_128 [1] : vector<1x8xf32> to vector<1xf32>
    %287 = vector.shape_cast %286 : vector<1xf32> to vector<1x1xf32>
    %288 = math.rsqrt %287 : vector<1x1xf32>
    %289 = vector.broadcast %288 : vector<1x1xf32> to vector<1x64xf32>
    %290 = arith.mulf %285, %289 : vector<1x64xf32>
    %291 = vector.shape_cast %290 : vector<1x64xf32> to vector<1x1x64xf32>
    %c0_129 = arith.constant 0 : index
    %c0_130 = arith.constant 0 : index
    %c0_131 = arith.constant 0 : index
    %292 = vector.load %arg33[%c0_129, %c0_130, %c0_131] : memref<1x1x64xf32, #tpu.memory_space<vmem>>, vector<1x1x64xf32>
    tpu.vector_store %arg33[%c0_129, %c0_130, %c0_131], %291 {strides = array<i32>} : memref<1x1x64xf32, #tpu.memory_space<vmem>>, vector<1x1x64xf32>,
    return
  }
  func.func @transform_0(%arg0: i32, %arg1: memref<2x8xi32, #tpu.memory_space<smem>>) -> (i32, i32, i32) {
    %c0_i32 = arith.constant 0 : i32
    %c0_i32_0 = arith.constant 0 : i32
    %c0_i32_1 = arith.constant 0 : i32
    return %arg0, %c0_i32, %c0_i32_0 : i32, i32, i32
  }
  func.func @transform_1(%arg0: i32, %arg1: memref<2x8xi32, #tpu.memory_space<smem>>) -> (i32, i32, i32) {
    %c0_i32 = arith.constant 0 : i32
    %c0_i32_0 = arith.constant 0 : i32
    %c0_i32_1 = arith.constant 0 : i32
    %c0_i32_2 = arith.constant 0 : i32
    return %c0_i32, %c0_i32_0, %c0_i32_1 : i32, i32, i32
  }
  func.func @transform_2(%arg0: i32, %arg1: memref<2x8xi32, #tpu.memory_space<smem>>) -> (i32, i32) {
    %c0_i32 = arith.constant 0 : i32
    %c0_i32_0 = arith.constant 0 : i32
    %c0_i32_1 = arith.constant 0 : i32
    return %c0_i32, %c0_i32_0 : i32, i32
  }
  func.func @transform_3(%arg0: i32, %arg1: memref<2x8xi32, #tpu.memory_space<smem>>) -> (i32, i32) {
    %c0_i32 = arith.constant 0 : i32
    %c0_i32_0 = arith.constant 0 : i32
    %c0_i32_1 = arith.constant 0 : i32
    return %c0_i32, %c0_i32_0 : i32, i32
  }
  func.func @transform_4(%arg0: i32, %arg1: memref<2x8xi32, #tpu.memory_space<smem>>) -> (i32, i32) {
    %c0_i32 = arith.constant 0 : i32
    %c0_i32_0 = arith.constant 0 : i32
    %c0_i32_1 = arith.constant 0 : i32
    return %c0_i32, %c0_i32_0 : i32, i32
  }
  func.func @transform_5(%arg0: i32, %arg1: memref<2x8xi32, #tpu.memory_space<smem>>) -> (i32, i32) {
    %c0_i32 = arith.constant 0 : i32
    %c0_i32_0 = arith.constant 0 : i32
    %c0_i32_1 = arith.constant 0 : i32
    return %c0_i32, %c0_i32_0 : i32, i32
  }
  func.func @transform_6(%arg0: i32, %arg1: memref<2x8xi32, #tpu.memory_space<smem>>) -> (i32, i32) {
    %c0_i32 = arith.constant 0 : i32
    %c0_i32_0 = arith.constant 0 : i32
    %c0_i32_1 = arith.constant 0 : i32
    return %c0_i32, %c0_i32_0 : i32, i32
  }
  func.func @transform_7(%arg0: i32, %arg1: memref<2x8xi32, #tpu.memory_space<smem>>) -> (i32, i32) {
    %c0_i32 = arith.constant 0 : i32
    %c0_i32_0 = arith.constant 0 : i32
    %c0_i32_1 = arith.constant 0 : i32
    return %c0_i32, %c0_i32_0 : i32, i32
  }
  func.func @transform_8(%arg0: i32, %arg1: memref<2x8xi32, #tpu.memory_space<smem>>) -> (i32, i32) {
    %c0_i32 = arith.constant 0 : i32
    %c0_i32_0 = arith.constant 0 : i32
    %c0_i32_1 = arith.constant 0 : i32
    return %c0_i32, %c0_i32_0 : i32, i32
  }
  func.func @transform_9(%arg0: i32, %arg1: memref<2x8xi32, #tpu.memory_space<smem>>) -> (i32, i32) {
    %c0_i32 = arith.constant 0 : i32
    %c0_i32_0 = arith.constant 0 : i32
    %c0_i32_1 = arith.constant 0 : i32
    return %c0_i32, %c0_i32_0 : i32, i32
  }
  func.func @transform_10(%arg0: i32, %arg1: memref<2x8xi32, #tpu.memory_space<smem>>) -> (i32, i32) {
    %c0_i32 = arith.constant 0 : i32
    %c0_i32_0 = arith.constant 0 : i32
    %c0_i32_1 = arith.constant 0 : i32
    return %c0_i32, %c0_i32_0 : i32, i32
  }
  func.func @transform_11(%arg0: i32, %arg1: memref<2x8xi32, #tpu.memory_space<smem>>) -> (i32, i32) {
    %c0_i32 = arith.constant 0 : i32
    %c0_i32_0 = arith.constant 0 : i32
    %c0_i32_1 = arith.constant 0 : i32
    return %c0_i32, %c0_i32_0 : i32, i32
  }
  func.func @transform_12(%arg0: i32, %arg1: memref<2x8xi32, #tpu.memory_space<smem>>) -> (i32, i32) {
    %c0_i32 = arith.constant 0 : i32
    %c0_i32_0 = arith.constant 0 : i32
    %c0_i32_1 = arith.constant 0 : i32
    return %c0_i32, %c0_i32_0 : i32, i32
  }
  func.func @transform_13(%arg0: i32, %arg1: memref<2x8xi32, #tpu.memory_space<smem>>) -> (i32, i32) {
    %c0_i32 = arith.constant 0 : i32
    %c0_i32_0 = arith.constant 0 : i32
    %c0_i32_1 = arith.constant 0 : i32
    return %c0_i32, %c0_i32_0 : i32, i32
  }
  func.func @transform_14(%arg0: i32, %arg1: memref<2x8xi32, #tpu.memory_space<smem>>) -> (i32, i32) {
    %c0_i32 = arith.constant 0 : i32
    %c0_i32_0 = arith.constant 0 : i32
    %c0_i32_1 = arith.constant 0 : i32
    return %c0_i32, %c0_i32_0 : i32, i32
  }
  func.func @transform_15(%arg0: i32, %arg1: memref<2x8xi32, #tpu.memory_space<smem>>) -> (i32, i32) {
    %c0_i32 = arith.constant 0 : i32
    %c0_i32_0 = arith.constant 0 : i32
    %c0_i32_1 = arith.constant 0 : i32
    return %c0_i32, %c0_i32_0 : i32, i32
  }
  func.func @transform_16(%arg0: i32, %arg1: memref<2x8xi32, #tpu.memory_space<smem>>) -> (i32, i32) {
    %c0_i32 = arith.constant 0 : i32
    %c0_i32_0 = arith.constant 0 : i32
    %c0_i32_1 = arith.constant 0 : i32
    return %c0_i32, %c0_i32_0 : i32, i32
  }
  func.func @transform_17(%arg0: i32, %arg1: memref<2x8xi32, #tpu.memory_space<smem>>) -> (i32, i32) {
    %c0_i32 = arith.constant 0 : i32
    %c0_i32_0 = arith.constant 0 : i32
    %c0_i32_1 = arith.constant 0 : i32
    return %c0_i32, %c0_i32_0 : i32, i32
  }
  func.func @transform_18(%arg0: i32, %arg1: memref<2x8xi32, #tpu.memory_space<smem>>) -> (i32, i32) {
    %c0_i32 = arith.constant 0 : i32
    %c0_i32_0 = arith.constant 0 : i32
    %c0_i32_1 = arith.constant 0 : i32
    return %c0_i32, %c0_i32_0 : i32, i32
  }
  func.func @transform_19(%arg0: i32, %arg1: memref<2x8xi32, #tpu.memory_space<smem>>) -> (i32, i32) {
    %c0_i32 = arith.constant 0 : i32
    %c0_i32_0 = arith.constant 0 : i32
    %c0_i32_1 = arith.constant 0 : i32
    return %c0_i32, %c0_i32_0 : i32, i32
  }
  func.func @transform_20(%arg0: i32, %arg1: memref<2x8xi32, #tpu.memory_space<smem>>) -> (i32, i32) {
    %c0_i32 = arith.constant 0 : i32
    %c0_i32_0 = arith.constant 0 : i32
    %c0_i32_1 = arith.constant 0 : i32
    return %c0_i32, %c0_i32_0 : i32, i32
  }
  func.func @transform_21(%arg0: i32, %arg1: memref<2x8xi32, #tpu.memory_space<smem>>) -> (i32, i32) {
    %c0_i32 = arith.constant 0 : i32
    %c0_i32_0 = arith.constant 0 : i32
    %c0_i32_1 = arith.constant 0 : i32
    return %c0_i32, %c0_i32_0 : i32, i32
  }
  func.func @transform_22(%arg0: i32, %arg1: memref<2x8xi32, #tpu.memory_space<smem>>) -> (i32, i32) {
    %c0_i32 = arith.constant 0 : i32
    %c0_i32_0 = arith.constant 0 : i32
    %c0_i32_1 = arith.constant 0 : i32
    return %c0_i32, %c0_i32_0 : i32, i32
  }
  func.func @transform_23(%arg0: i32, %arg1: memref<2x8xi32, #tpu.memory_space<smem>>) -> (i32, i32) {
    %c0_i32 = arith.constant 0 : i32
    %c0_i32_0 = arith.constant 0 : i32
    %c0_i32_1 = arith.constant 0 : i32
    return %c0_i32, %c0_i32_0 : i32, i32
  }
  func.func @transform_24(%arg0: i32, %arg1: memref<2x8xi32, #tpu.memory_space<smem>>) -> (i32, i32) {
    %c0_i32 = arith.constant 0 : i32
    %c0_i32_0 = arith.constant 0 : i32
    %c0_i32_1 = arith.constant 0 : i32
    return %c0_i32, %c0_i32_0 : i32, i32
  }
  func.func @transform_25(%arg0: i32, %arg1: memref<2x8xi32, #tpu.memory_space<smem>>) -> (i32, i32) {
    %c0_i32 = arith.constant 0 : i32
    %c0_i32_0 = arith.constant 0 : i32
    %c0_i32_1 = arith.constant 0 : i32
    return %c0_i32, %c0_i32_0 : i32, i32
  }
  func.func @transform_26(%arg0: i32, %arg1: memref<2x8xi32, #tpu.memory_space<smem>>) -> (i32, i32) {
    %c0_i32 = arith.constant 0 : i32
    %c0_i32_0 = arith.constant 0 : i32
    %c0_i32_1 = arith.constant 0 : i32
    return %c0_i32, %c0_i32_0 : i32, i32
  }
  func.func @transform_27(%arg0: i32, %arg1: memref<2x8xi32, #tpu.memory_space<smem>>) -> (i32, i32) {
    %c0_i32 = arith.constant 0 : i32
    %c0_i32_0 = arith.constant 0 : i32
    %c0_i32_1 = arith.constant 0 : i32
    return %c0_i32, %c0_i32_0 : i32, i32
  }
  func.func @transform_28(%arg0: i32, %arg1: memref<2x8xi32, #tpu.memory_space<smem>>) -> (i32, i32) {
    %c0_i32 = arith.constant 0 : i32
    %c0_i32_0 = arith.constant 0 : i32
    %c0_i32_1 = arith.constant 0 : i32
    return %c0_i32, %c0_i32_0 : i32, i32
  }
  func.func @transform_29(%arg0: i32, %arg1: memref<2x8xi32, #tpu.memory_space<smem>>) -> (i32, i32) {
    %c0_i32 = arith.constant 0 : i32
    %c0_i32_0 = arith.constant 0 : i32
    %c0_i32_1 = arith.constant 0 : i32
    return %c0_i32, %c0_i32_0 : i32, i32
  }
  func.func @transform_30(%arg0: i32, %arg1: memref<2x8xi32, #tpu.memory_space<smem>>) -> (i32, i32) {
    %c0_i32 = arith.constant 0 : i32
    %c0_i32_0 = arith.constant 0 : i32
    %c0_i32_1 = arith.constant 0 : i32
    return %c0_i32, %c0_i32_0 : i32, i32
  }
  func.func @transform_31(%arg0: i32, %arg1: memref<2x8xi32, #tpu.memory_space<smem>>) -> (i32, i32, i32) {
    %c0_i32 = arith.constant 0 : i32
    %c0_i32_0 = arith.constant 0 : i32
    %c0_i32_1 = arith.constant 0 : i32
    return %arg0, %c0_i32, %c0_i32_0 : i32, i32, i32
  }
}

</mosaic_0001>

<bundles_post_ra>
// kernel: tpu_custom_call.1
= control target key start
LH: loop header
LB: loop body
LE: loop exit
PB: predicated region body
PF: predicated region fallthrough
CT: control target
= control target key end

     0   :  { %s3720_s6 = smov 1   ;;  %s3721_s10 = smov 2   ;;  %s4373_s0 = inlined_call_operand.smem [shape: u32[33], index: -1, kind: input, shape index: {}] }
   0x1   :  { %s3779_s5 = sld [smem:[%s4373_s0]]   ;;  %s3722_s14 = smov 3  }
   0x2   :  { %s3784_s9 = sld [smem:[%s4373_s0 + %s3720_s6]]   ;;  %s3723_s18 = smov 4  }
   0x3   :  { %s3789_s13 = sld [smem:[%s4373_s0 + %s3721_s10]]   ;;  %s3724_s22 = smov 5  }
   0x4   :  { %s3794_s17 = sld [smem:[%s4373_s0 + %s3722_s14]]   ;;  %s3725_s26 = smov 6  }
   0x5   :  { %s3799_s21 = sld [smem:[%s4373_s0 + %s3723_s18]]   ;;  %s3726_s30 = smov 7  }
   0x6   :  { %s3804_s25 = sld [smem:[%s4373_s0 + %s3724_s22]]   ;;  %s3727_s4 = smov 8  }
   0x7   :  { %s3809_s29 = sld [smem:[%s4373_s0 + %s3725_s26]]   ;;  %s3728_s10 = smov 9  }
   0x8   :  { %s3814_s3 = sld [smem:[%s4373_s0 + %s3726_s30]]   ;;  %s3729_s15 = smov 10  }
   0x9   :  { %s3819_s8 = sld [smem:[%s4373_s0 + %s3727_s4]]   ;;  %s3730_s20 = smov 11  }
   0xa   :  { %s3824_s14 = sld [smem:[%s4373_s0 + %s3728_s10]]   ;;  %s3731_s26 = smov 12  }
   0xb   :  { %s3829_s19 = sld [smem:[%s4373_s0 + %s3729_s15]]   ;;  %s3732_s1 = smov 13  }
   0xc   :  { %s3834_s24 = sld [smem:[%s4373_s0 + %s3730_s20]]   ;;  %s3733_s7 = smov 14  }
   0xd   :  { %s3839_s30 = sld [smem:[%s4373_s0 + %s3731_s26]]   ;;  %s3734_s15 = smov 15  }
   0xe   :  { %4388 = sst [smem:[#allocation27_spill]] %s3814_s3  ;;  %s3735_s22 = smov 16  }
   0xf   :  { %s3844_s6 = sld [smem:[%s4373_s0 + %s3732_s1]]   ;;  %s3736_s28 = smov 17  }
  0x10   :  { %4389 = sst [smem:[#allocation28_spill]] %s3824_s14 }
  0x11   :  { %4390 = sst [smem:[#allocation29_spill]] %s3829_s19 }
  0x12   :  { %4391 = sst [smem:[#allocation30_spill]] %s3834_s24 }
  0x13   :  { %4392 = sst [smem:[#allocation31_spill]] %s3839_s30 }
  0x14   :  { %s3849_s12 = sld [smem:[%s4373_s0 + %s3733_s7]]   ;;  %s3737_s7 = smov 18  }
  0x15   :  { %4393 = sst [smem:[#allocation32_spill]] %s3844_s6 }
  0x16   :  { %s3854_s20 = sld [smem:[%s4373_s0 + %s3734_s15]]   ;;  %s3738_s15 = smov 19  }
  0x17   :  { %s3859_s27 = sld [smem:[%s4373_s0 + %s3735_s22]]   ;;  %s3739_s22 = smov 20  }
  0x18   :  { %s3864_s4 = sld [smem:[%s4373_s0 + %s3736_s28]]   ;;  %s3740_s28 = smov 21  }
  0x19   :  { %s3879_s24 = sld [smem:[%s4373_s0 + %s3739_s22]]   ;;  %s3743_s22 = smov 24  }
  0x1a   :  { %4394 = sst [smem:[#allocation33_spill]] %s3849_s12 }
  0x1b   :  { %s3869_s12 = sld [smem:[%s4373_s0 + %s3737_s7]]   ;;  %s3741_s7 = smov 22  }
  0x1c   :  { %4395 = sst [smem:[#allocation34_spill]] %s3854_s20 }
  0x1d   :  { %4396 = sst [smem:[#allocation35_spill]] %s3859_s27 }
  0x1e   :  { %4397 = sst [smem:[#allocation36_spill]] %s3864_s4 }
  0x1f   :  { %s3874_s20 = sld [smem:[%s4373_s0 + %s3738_s15]]   ;;  %s3742_s15 = smov 23  }
  0x20   :  { %4398 = sst [smem:[#allocation37_spill]] %s3879_s24  ;;  %s3747_s24 = smov 28  }
  0x21   :  { %s3884_s14 = sld [smem:[%s4373_s0 + %s3740_s28]]   ;;  %s3744_s28 = smov 25  }
  0x22   :  { %s3889_s6 = sld [smem:[%s4373_s0 + %s3741_s7]]   ;;  %s3745_s7 = smov 26  }
  0x23   :  { %s3894_s23 = sld [smem:[%s4373_s0 + %s3742_s15]]   ;;  %s3746_s15 = smov 27  }
  0x24   :  { %s3899_s1 = sld [smem:[%s4373_s0 + %s3743_s22]]  }
  0x25   :  { %s3904_s10 = sld [smem:[%s4373_s0 + %s3744_s28]]  }
  0x26   :  { %s3909_s16 = sld [smem:[%s4373_s0 + %s3745_s7]]  }
  0x27   :  { %4399 = sst [smem:[#allocation38_spill]] %s3884_s14  ;;  %s3748_s14 = smov 29  }
  0x28   :  { %4400 = sst [smem:[#allocation39_spill]] %s3889_s6  ;;  %s3749_s6 = smov 30  }
  0x29   :  { %4401 = sst [smem:[#allocation40_spill]] %s3894_s23  ;;  %s70_s23 = sshll.u32 %s3779_s5, 4  ;;  %s71_s23 = int_to_ptr.vmem [resolvable:$true] %s70_s23 }
  0x2a   :  { %4402 = sst [smem:[#allocation41_spill]] %s3899_s1  ;;  %s3390_s28 = scalar_lea.vmem %s71_s23, 32 }
  0x2b   :  { %4403 = sst [smem:[#allocation42_spill]] %s3904_s10  ;;  %p3391_p0 = scmp.ne.s32.totalorder %s71_s23, %s3390_s28 }
  0x2c   :  { %s3914_s30 = sld [smem:[%s4373_s0 + %s3746_s15]]   ;;  %s3750_s15 = smov 31  }
  0x2d   :  { %s3919_s19 = sld [smem:[%s4373_s0 + %s3747_s24]]   ;;  %s3751_s24 = smov 32  }
  0x2e   :  { %s3924_s10 = sld [smem:[%s4373_s0 + %s3748_s14]]   ;;  %p3395_p1 = scmp.lt.s32.totalorder %s71_s23, %s71_s23 }
  0x2f   :  { %s3929_s3 = sld [smem:[%s4373_s0 + %s3749_s6]]   ;;  %p3396_p2 = scmp.lt.s32.totalorder %s3390_s28, %s3390_s28 }
  0x30   :  { %s3935_s22 = sld [smem:[%s4373_s0 + %s3750_s15]]  }
  0x31   :  { %s3940_s14 = sld [smem:[%s4373_s0 + %s3751_s24]]   ;;  %p3397_p3 = por %p3396_p2, %p3395_p1 }
  0x32   :  { %4404 = sst [smem:[#allocation43_spill]] %s3914_s30 }
  0x33   :  { %4405 = sst [smem:[#allocation44_spill]] %s3919_s19  ;;  %p3398_p4 = pnand %p3397_p3, %p3391_p0 }
  0x35   :  { %3401 = shalt.err (!%p3398_p4)  }
  0x36   :  { %s3752_s5 = smov [#allocation3]  }
  0x37   :  { %73 = dma.vmem_to_smem %s71_s23, 32, %s3752_s5, [#allocation2] }
  0x38   :  { %3678 = dma.done.wait [#allocation2], 32 }
  0x39   :  { %3679 = vsyncadd [#allocation2], 4294967264 }
  0x3a   :  { %75 = sfence }
  0x3b   :  { %76 = vsyncpa [#allocation5], 0 }
  0x3c   :  { %77 = vsyncpa [#allocation8], 0 }
  0x3d   :  { %78 = vsyncpa [#allocation11], 0 }
  0x3e   :  { %79 = vsyncpa [#allocation14], 0 }
  0x3f   :  { %80 = vsyncpa [#allocation17], 0 }
  0x40   :  { %81 = vsyncpa [#allocation6], 0 }
  0x41   :  { %83 = vsyncpa [#allocation6 + $0x1], 0  ;;  %s3942_s0 = smov 0   ;;  %s3944_s19 = smov 0  }
  0x42   :  { %s3946_s30 = smov 0   ;;  %s3948_s2 = smov 0  }
  0x43 LB: > { %4406 = sst [smem:[#allocation45_spill]] %s3706_s0  ;;  %s3963_s6 = sadd.s32 4294967295, %s3718_s2   ;;  %s3718_s2 = sphi %s3948_s2, %s4454_s2   ;;  %s3714_s30 = sphi %s3946_s30, %s4456_s30   ;;  %s3710_s19 = sphi %s3944_s19, %s4458_s19   ;;  %s3706_s0 = sphi %s3942_s0, %s4457_s0  }
  0x44   : > { %4407 = sst [smem:[#allocation46_spill]] %s3714_s30  ;;  %s2900_s7 = sadd.s32 4294967294, %s3718_s2  }
  0x45   : > { %4408 = sst [smem:[#allocation47_spill]] %s3718_s2  ;;  %s3967_s11 = sadd.s32 1, %s3718_s2  }
  0x46   : > { %4409 = sst [smem:[#allocation48_spill]] %s3967_s11  ;;  %s752_s23 = sadd.s32 1, %s3714_s30 }
  0x47   : > { %s749_s15 = ssub.s32 %s3718_s2, %s3967_s11  ;;  %p762_p5 = scmp.ne.s32.totalorder %s3714_s30, %s3710_s19 }
  0x48   : > { %p750_p6 = scmp.eq.s32.totalorder %s749_s15, 0  ;;  %p763_p7 = scmp.eq.s32.totalorder %s3963_s6, 1 }
  0x49   : > { %p768_p8 = scmp.ne.s32.totalorder %s3710_s19, %s3706_s0  ;;  %p769_p9 = scmp.eq.s32.totalorder %s2900_s7, 1 }
  0x4a   : > { %s3978_s18 = scalar_select %p750_p6, %s3714_s30, %s752_s23  }
  0x4b   : > { %p3980_p10 = por %p763_p7, %p762_p5  ;;  %p3984_p11 = por %p769_p9, %p768_p8 }
  0x4c   : > { %4410 = sst [smem:[#allocation49_spill]] %s3978_s18  ;;  %p2901_p12 = scmp.ge.s32.totalorder %s3718_s2, 1 }
  0x4d   : > { %s4411_s24 = scalar_select %p3980_p10, 1, 0 }
  0x4e   : > { %s4412_s26 = scalar_select %p3984_p11, 1, 0 }
  0x4f   : > { %p776_p13 = scmp.lt.s32.totalorder %s3718_s2, 3  ;;  %p4383_p0 = scmp.eq.s32.totalorder %s3963_s6, 0 }
  0x50   : > { %4413 = sst [smem:[#allocation50_spill]] %s4412_s26  ;;  %s3753_s5 = smov [#allocation7]  }
  0x51   : > { %p3991_p1 = pnand %p2901_p12, %p776_p13  ;;  %s810_s7 = sshll.u32 %s3753_s5, 4  ;;  %s811_s7 = int_to_ptr.vmem [resolvable:$true] %s810_s7 }
  0x52   : > { %s3754_s15 = smov [#allocation10]   ;;  %s3755_s30 = smov [#allocation13]  }
  0x53   : > { %s4414_s28 = scalar_select %p3991_p1, 1, 0 }
  0x54   : > { %p3233_p2 = pneg %p3991_p1  ;;  %s861_s18 = sshll.u32 %s3754_s15, 4  ;;  %s862_s18 = int_to_ptr.vmem [resolvable:$true] %s861_s18 }
  0x55   : > { %s882_s11 = sshll.u32 %s3755_s30, 4  ;;  %s3413_s0 = scalar_lea.vmem %s811_s7, 512  ;;  %s883_s11 = int_to_ptr.vmem [resolvable:$true] %s882_s11 }
  0x56   : > { %p3999_p3 = pnand %p4383_p0, %p3233_p2  ;;  %p3414_p5 = scmp.ne.s32.totalorder %s811_s7, %s3413_s0 }
  0x57   : > { %p3421_p8 = scmp.lt.s32.totalorder %s811_s7, %s811_s7  ;;  %p3422_p9 = scmp.lt.s32.totalorder %s3413_s0, %s3413_s0 }
  0x58   : > { %p4005_p4 = pneg %p3999_p3 }
  0x59   : > { %p3423_p12 = por %p3422_p9, %p3421_p8 }
  0x5a   : > { %p3416_p6 = pnand %p3414_p5, %p4005_p4 }
  0x5c   : > { %p3417_p7 = pneg %p3416_p6 }
  0x5e   : > { %p3424_p13 = pnand %p3423_p12, %p3417_p7 }
  0x60   : > { %3427 = shalt.err (!%p3424_p13)
}
  0x61   : > { %s4386_s5 = smov 128   ;;  %s4387_s30 = smov 8  }
  0x62   : > { %3239 = dma.hbm_to_vmem [thread:$0]  (!%p3999_p3), %s3809_s29, 512, %s811_s7, [#allocation8], %s4386_s5, %s4386_s5, %s4387_s30  }
  0x63   : > { %s3439_s15 = scalar_lea.vmem %s862_s18, 16  ;;  %s3446_s2 = scalar_lea.vmem %s862_s18, 32 }
  0x64   : > { %p3440_p2 = scmp.ne.s32.totalorder %s862_s18, %s3439_s15  ;;  %p3447_p0 = scmp.lt.s32.totalorder %s862_s18, %s862_s18 }
  0x65   : > { %p3448_p8 = scmp.lt.s32.totalorder %s3446_s2, %s3439_s15 }
  0x66   : > { %p3442_p5 = pnand %p3440_p2, %p4005_p4 }
  0x67   : > { %p3449_p7 = por %p3448_p8, %p3447_p0 }
  0x68   : > { %p3443_p6 = pneg %p3442_p5 }
  0x6a   : > { %p3450_p9 = pnand %p3449_p7, %p3443_p6 }
  0x6c   : > { %3453 = shalt.err (!%p3450_p9)
}
  0x6d   : > { %s4417_s27 = sld [smem:[#allocation35_spill]]  ;;  %s3465_s0 = scalar_lea.vmem %s883_s11, 512 }
  0x6e   : > { %p3466_p12 = scmp.ne.s32.totalorder %s883_s11, %s3465_s0  ;;  %p3473_p10 = scmp.lt.s32.totalorder %s883_s11, %s883_s11 }
  0x6f   : > { %p3474_p2 = scmp.lt.s32.totalorder %s3465_s0, %s3465_s0 }
  0x70   : > { %p3468_p13 = pnand %p3466_p12, %p4005_p4 }
  0x71   : > { %p3475_p5 = por %p3474_p2, %p3473_p10 }
  0x72   : > { %p3469_p11 = pneg %p3468_p13 }
  0x73   : > { %3245 = dma.hbm_to_vmem [thread:$0]  (!%p3999_p3), %s4417_s27, 16, %s862_s18, [#allocation11]  }
  0x74   : > { %p3476_p1 = pnand %p3475_p5, %p3469_p11 }
  0x76   : > { %3479 = shalt.err (!%p3476_p1)
}
  0x77   : > { %3251 = dma.hbm_to_vmem [thread:$0]  (!%p3999_p3), %s3869_s12, 512, %s883_s11, [#allocation14], %s4386_s5, %s4386_s5, %s4387_s30  }
  0x78   : > { %s3758_s2 = smov [#allocation16]   ;;  %s3759_s7 = smov [#allocation4]  }
  0x79   : > { %s918_s18 = sshll.u32 %s3758_s2, 4  ;;  %s794_s15 = sshll.u32 %s3759_s7, 4  ;;  %s919_s18 = int_to_ptr.vmem [resolvable:$true] %s918_s18  ;;  %s795_s15 = int_to_ptr.vmem [resolvable:$true] %s794_s15 }
  0x7a   : > { %s3491_s27 = scalar_lea.vmem %s919_s18, 1024  ;;  %p3499_p11 = scmp.lt.s32.totalorder %s919_s18, %s919_s18 }
  0x7b   : > { %p3492_p0 = scmp.ne.s32.totalorder %s919_s18, %s3491_s27  ;;  %p3500_p1 = scmp.lt.s32.totalorder %s3491_s27, %s3491_s27 }
  0x7d   : > { %p3494_p6 = pnand %p3492_p0, %p4005_p4  ;;  %p3501_p8 = por %p3500_p1, %p3499_p11 }
  0x7f   : > { %p3495_p10 = pneg %p3494_p6 }
  0x81   : > { %p3502_p7 = pnand %p3501_p8, %p3495_p10 }
  0x83   : > { %3505 = shalt.err (!%p3502_p7)
}
  0x84   : > { %s4418_s1 = sld [smem:[#allocation41_spill]]  ;;  %s3517_s11 = scalar_lea.vmem %s795_s15, 512 }
  0x85   : > { %p3518_p9 = scmp.ne.s32.totalorder %s795_s15, %s3517_s11  ;;  %p3525_p2 = scmp.lt.s32.totalorder %s795_s15, %s795_s15 }
  0x86   : > { %p3526_p5 = scmp.lt.s32.totalorder %s3517_s11, %s3517_s11 }
  0x87   : > { %p3520_p12 = pnand %p3518_p9, %p4005_p4 }
  0x88   : > { %p3527_p0 = por %p3526_p5, %p3525_p2 }
  0x89   : > { %p3521_p13 = pneg %p3520_p12 }
  0x8a   : > { %3257 = dma.hbm_to_vmem [thread:$0]  (!%p3999_p3), %s4418_s1, 1024, %s919_s18, [#allocation17], %s4386_s5, %s4386_s5, %s4387_s30  }
  0x8b   : > { %p3528_p6 = pnand %p3527_p0, %p3521_p13 }
  0x8d   : > { %3531 = shalt.err (!%p3528_p6)
}
  0x8e   : > { %3236 = dma.hbm_to_vmem [thread:$0]  (!%p3999_p3), %s3799_s21, 512, %s795_s15, [#allocation5], %s4386_s5, %s4386_s5, %s4387_s30  }
  0x8f   : > { %s3760_s27 = smov [#allocation9]   ;;  %s3761_s2 = smov [#allocation12]  }
  0x90   : > { %s826_s0 = sshll.u32 %s3760_s27, 4  ;;  %s872_s18 = sshll.u32 %s3761_s2, 4  ;;  %s827_s0 = int_to_ptr.vmem [resolvable:$true] %s826_s0  ;;  %s873_s18 = int_to_ptr.vmem [resolvable:$true] %s872_s18 }
  0x91   : > { %s3543_s7 = scalar_lea.vmem %s827_s0, 512  ;;  %p3551_p8 = scmp.lt.s32.totalorder %s827_s0, %s827_s0 }
  0x92   : > { %p3544_p10 = scmp.ne.s32.totalorder %s827_s0, %s3543_s7  ;;  %p3552_p7 = scmp.lt.s32.totalorder %s3543_s7, %s3543_s7 }
  0x94   : > { %p3546_p11 = pnand %p3544_p10, %p4005_p4  ;;  %p3553_p9 = por %p3552_p7, %p3551_p8 }
  0x96   : > { %p3547_p1 = pneg %p3546_p11 }
  0x98   : > { %p3554_p12 = pnand %p3553_p9, %p3547_p1 }
  0x9a   : > { %3557 = shalt.err (!%p3554_p12)
}
  0x9b   : > { %3242 = dma.hbm_to_vmem [thread:$0]  (!%p3999_p3), %s3819_s8, 512, %s827_s0, [#allocation8], %s4386_s5, %s4386_s5, %s4387_s30  }
  0x9c   : > { %s3569_s15 = scalar_lea.vmem %s873_s18, 16  ;;  %s3576_s11 = scalar_lea.vmem %s873_s18, 32 }
  0x9d   : > { %p3570_p13 = scmp.ne.s32.totalorder %s873_s18, %s3569_s15  ;;  %p3577_p0 = scmp.lt.s32.totalorder %s873_s18, %s873_s18 }
  0x9e   : > { %p3578_p6 = scmp.lt.s32.totalorder %s3576_s11, %s3569_s15 }
  0x9f   : > { %p3572_p2 = pnand %p3570_p13, %p4005_p4 }
  0xa0   : > { %p3579_p10 = por %p3578_p6, %p3577_p0 }
  0xa1   : > { %p3573_p5 = pneg %p3572_p2 }
  0xa3   : > { %p3580_p11 = pnand %p3579_p10, %p3573_p5 }
  0xa5   : > { %3583 = shalt.err (!%p3580_p11)
}
  0xa6   : > { %s4419_s4 = sld [smem:[#allocation36_spill]]  ;;  %s3762_s27 = smov [#allocation15]  }
  0xa7   : > { %s896_s2 = sshll.u32 %s3762_s27, 4  ;;  %s3763_s0 = smov [#allocation18]   ;;  %s897_s2 = int_to_ptr.vmem [resolvable:$true] %s896_s2 }
  0xa8   : > { %s934_s7 = sshll.u32 %s3763_s0, 4  ;;  %s3595_s5 = scalar_lea.vmem %s897_s2, 16  ;;  %s935_s7 = int_to_ptr.vmem [resolvable:$true] %s934_s7 }
  0xa9   : > { %p3596_p1 = scmp.ne.s32.totalorder %s897_s2, %s3595_s5  ;;  %s3602_s30 = scalar_lea.vmem %s897_s2, 32 }
  0xaa   : > { %p3603_p9 = scmp.lt.s32.totalorder %s897_s2, %s897_s2  ;;  %p3604_p12 = scmp.lt.s32.totalorder %s3602_s30, %s3595_s5 }
  0xab   : > { %p3598_p8 = pnand %p3596_p1, %p4005_p4 }
  0xac   : > { %3248 = dma.hbm_to_vmem [thread:$0]  (!%p3999_p3), %s4419_s4, 16, %s873_s18, [#allocation11]  }
  0xad   : > { %p3599_p7 = pneg %p3598_p8  ;;  %p3605_p13 = por %p3604_p12, %p3603_p9 }
  0xaf   : > { %p3606_p2 = pnand %p3605_p13, %p3599_p7 }
  0xb1   : > { %3609 = shalt.err (!%p3606_p2)
}
  0xb2   : > { %3254 = dma.hbm_to_vmem [thread:$0]  (!%p3999_p3), %s3874_s20, 16, %s897_s2, [#allocation14]  }
  0xb3   : > { %s3621_s18 = scalar_lea.vmem %s935_s7, 1024  ;;  %p3629_p10 = scmp.lt.s32.totalorder %s935_s7, %s935_s7 }
  0xb4   : > { %p3622_p5 = scmp.ne.s32.totalorder %s935_s7, %s3621_s18  ;;  %p3630_p11 = scmp.lt.s32.totalorder %s3621_s18, %s3621_s18 }
  0xb6   : > { %p3624_p0 = pnand %p3622_p5, %p4005_p4  ;;  %p3631_p1 = por %p3630_p11, %p3629_p10 }
  0xb8   : > { %p3625_p6 = pneg %p3624_p0 }
  0xba   : > { %p3632_p8 = pnand %p3631_p1, %p3625_p6 }
  0xbc   : > { %3635 = shalt.err (!%p3632_p8)
}
  0xbd   : > { %s4420_s5 = smov 8   ;;  %s4421_s30 = smov 128  }
  0xbe   : > { %3260 = dma.hbm_to_vmem [thread:$0]  (!%p3999_p3), %s3909_s16, 1024, %s935_s7, [#allocation17], %s4421_s30, %s4421_s30, %s4420_s5  }
  0xbf   : > { %p4422_p7 = scmp.ne.s32.totalorder %s4414_s28, 0 }
  0xc0   : > { %p4423_p9 = scmp.eq.s32.totalorder (!%p4422_p7), %s3963_s6, 0 }
  0xc1   : > { %971 = sbr.rel (%p4422_p7) target bundleno = 5614 (0x15ee), region = 144 }
  0xc6   : > { %3681 = dma.done.wait (%p4423_p9), [#allocation5], 512   ;;  %p4424_p4 = pmov %p4423_p9 }
  0xc8   : > { %3683 = vsyncadd (%p4424_p4), [#allocation5], 4294966784  ;;  %p4425_p12 = pmov %p4424_p4 }
  0xc9   : > { %p4426_p13 = pmov %p4424_p4 }
  0xca   : > { %3685 = dma.done.wait (%p4425_p12), [#allocation8], 1024  }
  0xcb   : > { %3687 = vsyncadd (%p4426_p13), [#allocation8], 4294966272  ;;  %p4427_p2 = pmov %p4424_p4 }
  0xcd   : > { %3689 = dma.done.wait (%p4427_p2), [#allocation11], 32   ;;  %p4428_p3 = pmov %p4427_p2 }
  0xce   : > { %p4429_p5 = pmov %p4427_p2 }
  0xcf   : > { %3691 = vsyncadd (%p4428_p3), [#allocation11], 4294967264 }
  0xd0   : > { %3693 = dma.done.wait (%p4429_p5), [#allocation14], 528   ;;  %p4430_p0 = pmov %p4427_p2 }
  0xd2   : > { %3695 = vsyncadd (%p4430_p0), [#allocation14], 4294966768  ;;  %p4431_p6 = pmov %p4430_p0 }
  0xd3   : > { %p4432_p10 = pmov %p4430_p0 }
  0xd4   : > { %3697 = dma.done.wait (%p4431_p6), [#allocation17], 2048  }
  0xd5   : > { %3699 = vsyncadd (%p4432_p10), [#allocation17], 4294965248  ;;  %s4095_s26 = sshll.u32 %s3963_s6, 7  ;;  %v3764_v0 = vmov 0.0   ;;  %vm3765_vm0 = vmmov 0   ;;  %v1177_v1 = vld [vmem:[#allocation4 + $0x18] sm:$0xff]  ;;  %v1361_v27 = vlaneseq }
  0xd6   : > { %3040 = vmatprep.subr.mxu1 %v3764_v0  ;;  %3048 = vmatprep.mubr.msk.f32.mxu1 %vm3765_vm0, %v3764_v0  ;;  %s1084_s28 = sld [smem:[#allocation3 + %s4095_s26]]  ;;  %s1087_s23 = sadd.s32 1, %s4095_s26  ;;  %v1176_v2 = vld [vmem:[#allocation4 + $0x10] sm:$0xff]  ;;  %vm1157_vm1 = vcmask 1040384   ;;  %vm1159_vm2 = vcmask 1041408   ;;  %v1175_v4 = vld [vmem:[#allocation4 + $0x8] sm:$0xff] }
  0xd7   : > { %s1088_s15 = sld [smem:[#allocation3 + %s1087_s23]]  ;;  %s1091_s11 = sadd.s32 2, %s4095_s26  ;;  %3056 = vmatprep.subr.mxu0 %v3764_v0  ;;  %3058 = vmatprep.mubr.msk.f32.mxu0 %vm3765_vm0, %v3764_v0  ;;  %vm1161_vm3 = vcmask 1042432   ;;  %vm1163_vm4 = vcmask 1043456   ;;  %v1174_v8 = vld [vmem:[#allocation4] sm:$0xff]  ;;  %vm1165_vm5 = vcmask 1044480  }
  0xd8   : > { %s1092_s27 = sld [smem:[#allocation3 + %s1091_s11]]  ;;  %s1095_s2 = sadd.s32 3, %s4095_s26  ;;  %3041 = vmatpush3.msra.mxu1 %v1177_v1  ;;  %vm1167_vm6 = vcmask 1045504   ;;  %vm1169_vm7 = vcmask 1046528   ;;  %v1171_v18 = vld [vmem:[%s3794_s17] sm:$0xff]  ;;  %vm1208_vm8 = vcmask 261120  }
  0xd9   : > { %s4107_s0 = sld [smem:[#allocation3 + %s1095_s2]]  ;;  %s1099_s7 = sadd.s32 4, %s4095_s26  ;;  %3042 = vmatprep.subr.mxu1 %v3764_v0  ;;  %v2930_v22 = vld [vmem:[%s3804_s25] ss:$0 sm:$0xff]  ;;  %v4158_v29 = vshrl.u32 %v1361_v27, 7  ;;  %v3767_v31 = vmov 0  }
  0xda   : > { %s4110_s18 = sld [smem:[#allocation3 + %s1099_s7]]  ;;  %s1103_s5 = sadd.s32 5, %s4095_s26  ;;  %3043 = vmatpush3.msra.mxu1 %v1176_v2  ;;  %vm1367_vm11 = vcmask 64512   ;;  %v1182_v47 = vld [vmem:[#allocation7 + $0x18] sm:$0xff]  ;;  %v1181_v48 = vld [vmem:[#allocation7 + $0x10] sm:$0xff]  ;;  %v1180_v49 = vld [vmem:[#allocation7 + $0x8] sm:$0xff] }
  0xdb   : > { %s4113_s30 = sld [smem:[#allocation3 + %s1103_s5]]  ;;  %s1107_s23 = sadd.s32 6, %s4095_s26  ;;  %3044 = vmatprep.subr.mxu1 %v3764_v0  ;;  %v1363_v30 = vsub.s32 0, %v4158_v29  ;;  %v1179_v50 = vld [vmem:[#allocation7] sm:$0xff]  ;;  %v1187_v1 = vld [vmem:[#allocation9 + $0x18] sm:$0xff]  ;;  %v1186_v2 = vld [vmem:[#allocation9 + $0x10] sm:$0xff] }
  0xdc   : > { %s1085_s1 = scalar_lea.vmem %s3789_s13, %s1084_s28  ;;  %s4117_s4 = sld [smem:[#allocation3 + %s1107_s23]]  ;;  %3045 = vmatpush3.msra.mxu1 %v1175_v4  ;;  %v1184_v4 = vld [vmem:[#allocation9] sm:$0xff]  ;;  %vm1649_vm12 = vcmask 523264   ;;  %vm2699_vm13 = vcmask 57344   ;;  %vm2705_vm14 = vcmask 516096  }
  0xdd   : > { %v1086_v3 = vld [vmem:[%s1085_s1] sm:$0x1]  ;;  %s1089_s11 = scalar_lea.vmem %s3789_s13, %s1088_s15  ;;  %s1111_s2 = sadd.s32 7, %s4095_s26  ;;  %3046 = vmatprep.subr.mxu1 %v3764_v0 }
  0xde   : > { %v2923_v5 = vld [vmem:[%s1089_s11] ss:$0 sm:$0xff]  ;;  %s1093_s7 = scalar_lea.vmem %s3789_s13, %s1092_s27  ;;  %s4123_s28 = sld [smem:[#allocation3 + %s1111_s2]]  ;;  %3047 = vmatpush3.msra.mxu1 %v1174_v8 }
  0xdf   : > { %v2924_v6 = vld [vmem:[%s1093_s7] ss:$0 sm:$0xff]  ;;  %s1097_s5 = scalar_lea.vmem %s3789_s13, %s4107_s0  ;;  %v1158_v7 = vsel %vm1157_vm1, %v1086_v3, %v2923_v5  ;;  %3051 = vmatprep.subr.mxu1 %v3764_v0  ;;  %p1080_p11 = scmp.lt.s32.totalorder %s3963_s6, 1  ;;  %v1185_v3 = vld [vmem:[#allocation9 + $0x8] sm:$0xff] }
  0xe0   : > { %v2925_v9 = vld [vmem:[%s1097_s5] ss:$0 sm:$0xff]  ;;  %s1101_s1 = scalar_lea.vmem %s3789_s13, %s4110_s18  ;;  %v1160_v10 = vsel %vm1159_vm2, %v1158_v7, %v2924_v6  ;;  %s4433_s23 = sld [smem:[#allocation27_spill]] }
  0xe1   : > { %v2926_v11 = vld [vmem:[%s1101_s1] ss:$0 sm:$0xff]  ;;  %s1105_s26 = scalar_lea.vmem %s3789_s13, %s4113_s30  ;;  %v1162_v12 = vsel %vm1161_vm3, %v1160_v10, %v2925_v9  ;;  %s3768_s30 = smov 64  }
  0xe2   : > { %v2927_v13 = vld [vmem:[%s1105_s26] ss:$0 sm:$0xff]  ;;  %s1109_s15 = scalar_lea.vmem %s3789_s13, %s4117_s4  ;;  %v1164_v14 = vsel %vm1163_vm4, %v1162_v12, %v2926_v11  ;;  %s3766_s4 = smov 96  }
  0xe3   : > { %v2928_v15 = vld [vmem:[%s1109_s15] ss:$0 sm:$0xff]  ;;  %v1166_v16 = vsel %vm1165_vm5, %v1164_v14, %v2927_v13  ;;  %s1081_s0 = scalar_select %p1080_p11, %s3963_s6, 1 }
  0xe4   : > { %s1113_s27 = scalar_lea.vmem %s3789_s13, %s4123_s28  ;;  %v1168_v17 = vsel %vm1167_vm6, %v1166_v16, %v2928_v15  ;;  %s4434_s11 = sld [smem:[#allocation29_spill]] }
  0xe5   : > { %v2929_v19 = vld [vmem:[%s1113_s27] ss:$0 sm:$0xff]  ;;  %s1082_s18 = scalar_lea.vmem %s3784_s9, %s1081_s0  ;;  %s4435_s2 = sld [smem:[#allocation31_spill]] }
  0xe6   : > { %v1170_v20 = vsel %vm1169_vm7, %v1168_v17, %v2929_v19  ;;  %v4156_v28 = vld [vmem:[%s1082_s18] sm:$0x1]  ;;  %s4436_s7 = sld [smem:[#allocation32_spill]]  ;;  %p4449_p8 = scmp.ne.s32.totalorder %s4411_s24, 0 }
  0xe7   : > { %v4140_v21 = vadd.f32 %v1171_v18, %v1170_v20  ;;  %vm1359_vm9 = vcmp.gt.f32.partialorder %v4156_v28, 0.5  ;;  %v2935_v53 = vld [vmem:[%s4433_s23] ss:$0 sm:$0xff]  ;;  %s4437_s28 = sld [smem:[#allocation28_spill]] }
  0xe8   : > { %v1360_v32 = vsel %vm1359_vm9, 1, %v3767_v31  ;;  %s4438_s5 = sld [smem:[#allocation30_spill]] }
  0xe9   : > { %3049 = vmatmul.mubr.msk.f32.vlgmr.msra.gmra.mxu1 %vm1208_vm8, %v4140_v21  ;;  %v4164_v33 = vrot.slane %v1360_v32, %v1363_v30  ;;  %s4439_s1 = sld [smem:[#allocation33_spill]] }
  0xea   : > { %3053 = vmatprep.mubr.msk.f32.mxu1 %vm3765_vm0, %v3764_v0  ;;  %v1196_v5 = vld [vmem:[%s4434_s11 + $0x38] sm:$0xff]  ;;  %v1195_v6 = vld [vmem:[%s4434_s11 + $0x30] sm:$0xff]  ;;  %v1194_v7 = vld [vmem:[%s4434_s11 + $0x28] sm:$0xff]  ;;  %s4440_s26 = sld [smem:[#allocation34_spill]] }
  0xeb   : > { %vm1365_vm10 = vcmp.eq.s32.totalorder %v4164_v33, 1  ;;  %v1193_v8 = vld [vmem:[%s4434_s11 + $0x20] sm:$0xff]  ;;  %v1192_v9 = vld [vmem:[%s4434_s11 + $0x18] sm:$0xff]  ;;  %v1191_v19 = vld [vmem:[%s4434_s11 + $0x10] sm:$0xff]  ;;  %s4441_s15 = sld [smem:[#allocation37_spill]] }
  0xec   : > { %v2937_v14 = vld [vmem:[%s4435_s2] ss:$0 sm:$0xff]  ;;  %v1190_v20 = vld [vmem:[%s4434_s11 + $0x8] sm:$0xff]  ;;  %s4442_s27 = sld [smem:[#allocation38_spill]] }
  0xed   : > { %v2938_v16 = vld [vmem:[%s4436_s7] ss:$0 sm:$0xff]  ;;  %s4443_s0 = sld [smem:[#allocation39_spill]] }
  0xee   : > { %v2941_v27 = vld [vmem:[%s4438_s5] ss:$0 sm:$0xff]  ;;  %s4446_s23 = sld [smem:[#allocation44_spill]]  ;;  %s2967_s5 = sshll.u32 %s3963_s6, 4 }
  0xef   : > { %s4447_s2 = sld [smem:[#allocation42_spill]] }
  0xf0   : > { %s4448_s7 = sld [smem:[#allocation43_spill]] }
  0xf3   : > { %s4444_s18 = smov %s4443_s0 }
 0x1a9   : > { %v1278_v23 = vpop.f32.mrf.mxu1 }
 0x1aa   : > { %v1279_v24 = vadd.f32 %v2930_v22, %v1278_v23  ;;  %v2939_v22 = vld [vmem:[%s4437_s28] ss:$0 sm:$0xff]  ;;  %s1078_s28 = sand.u32 1, %s3710_s19  }
 0x1ab   : > { %v3050_v25 = vpop.f32.mrf.mxu1 }
 0x1ac   : > { %1283 = vrot.lane.b32.xlu0 %v1279_v24, %s3766_s4 }
 0x21e   : > { %v1284_v26 = vpop.permute.xlu0 %1283 }
 0x21f   : > { %3052 = vmatpush3.xpose.msk.msra.mxu1 %vm1208_vm8, %v1284_v26 }
 0x220   : > { %3072 = vmatprep.subr.mxu1 %v3764_v0 }
 0x222   : > { %3054 = vmatmul.mubr.msk.f32.vlgmr.msra.gmra.mxu1 %vm1208_vm8, %v1279_v24 }
 0x223   : > { %3080 = vmatprep.mubr.msk.f32.mxu1 %vm3765_vm0, %v3764_v0  ;;  %3073 = vmatpush3.msra.mxu1 %v1187_v1 }
 0x224   : > { %3074 = vmatprep.subr.mxu1 %v3764_v0 }
 0x225   : > { %3075 = vmatpush3.msra.mxu1 %v1186_v2 }
 0x226   : > { %3076 = vmatprep.subr.mxu1 %v3764_v0 }
 0x227   : > { %3077 = vmatpush3.msra.mxu1 %v1185_v3  ;;  %v2945_v3 = vld [vmem:[#allocation10] ss:$0 sm:$0xff] }
 0x228   : > { %3078 = vmatprep.subr.mxu1 %v3764_v0 }
 0x229   : > { %3079 = vmatpush3.msra.mxu1 %v1184_v4 }
 0x22a   : > { %3102 = vmatprep.subr.mxu1 %v3764_v0 }
 0x2e2   : > { %v1355_v34 = vpop.f32.mrf.mxu1 }
 0x2e3   : > { %v1366_v35 = vsel %vm1365_vm10, %v1355_v34, -1e+30 }
 0x2e4   : > { %v3055_v36 = vpop.f32.mrf.mxu1  ;;  %v1368_v37 = vsel %vm1367_vm11, %v1366_v35, -inf }
 0x2e5   : > { %1369 = vmax.xlane.f32.xlu0 %v1368_v37 }
 0x36e   : > { %v1370_v38 = vpop.xlane.xlu0 %1369 }
 0x36f   : > { %v1371_v39 = vsub.f32 %v1366_v35, %v1370_v38 }
 0x371   : > { %v1372_v40 = vmul.f32 1.442695, %v1371_v39 }
 0x373   : > { %3366 = vpow2.f32 %v1372_v40 }
 0x380   : > { %v3367_v41 = vpop.eup %3366 }
 0x381   : > { %v1374_v42 = vsel %vm1367_vm11, %v3367_v41, 0.0 }
 0x382   : > { %1375 = vadd.xlane.f32.xlu1 %v1374_v42 }
 0x393   : > { %1379 = vrot.lane.b32.xlu1 %v1279_v24, %s3768_s30 }
 0x40b   : > { %v1376_v43 = vpop.xlane.xlu1 %1375 }
 0x40c   : > { %3368 = vrcp.f32 %v1376_v43 }
 0x40f   : > { %v1380_v44 = vpop.permute.xlu1 %1379 }
 0x410   : > { %3057 = vmatpush3.msra.mxu0 %v1380_v44 }
 0x411   : > { %3061 = vmatprep.subr.mxu0 %v3764_v0 }
 0x419   : > { %v3369_v45 = vpop.eup %3368 }
 0x41a   : > { %v1378_v46 = vmul.f32 %v3369_v45, %v3367_v41 }
 0x41c   : > { %3059 = vmatmul.mubr.msk.f32.vlgmr.msra.gmra.mxu0 %vm1367_vm11, %v1378_v46  ;;  %v2943_v46 = vld [vmem:[%s4439_s1] ss:$0 sm:$0xff]  ;;  %s1079_s1 = scalar_lea.vmem [#allocation19], %s1078_s28 }
 0x41d   : > { %3062 = vmatpush3.msra.mxu0 %v1182_v47  ;;  %3069 = vmatprep.mubr.msk.f32.mxu0 %vm3765_vm0, %v3764_v0 }
 0x41e   : > { %3063 = vmatprep.subr.mxu0 %v3764_v0 }
 0x41f   : > { %3064 = vmatpush3.msra.mxu0 %v1181_v48  ;;  %v2944_v48 = vld [vmem:[%s4440_s26] ss:$0 sm:$0xff]  ;;  %s2720_s26 = sshll.u32 %s1079_s1, 4  ;;  %s2721_s26 = int_to_ptr.vmem [resolvable:$true] %s2720_s26 }
 0x420   : > { %3065 = vmatprep.subr.mxu0 %v3764_v0 }
 0x421   : > { %3066 = vmatpush3.msra.mxu0 %v1180_v49 }
 0x422   : > { %3067 = vmatprep.subr.mxu0 %v3764_v0 }
 0x423   : > { %3068 = vmatpush3.msra.mxu0 %v1179_v50 }
 0x424   : > { %3083 = vmatprep.subr.mxu0 %v3764_v0 }
 0x4dc   : > { %v1451_v51 = vpop.f32.mrf.mxu0 }
 0x4dd   : > { %3070 = vmatmul.mubr.msk.f32.vlgmr.msra.gmra.mxu0 %vm1208_vm8, %v1451_v51 }
 0x4de   : > { %v3060_v52 = vpop.f32.mrf.mxu0  ;;  %3099 = vmatprep.mubr.msk.f32.mxu0 %vm3765_vm0, %v3764_v0  ;;  %3084 = vmatpush3.msra.mxu0 %v1196_v5  ;;  %v2946_v5 = vld [vmem:[#allocation12] ss:$0 sm:$0xff] }
 0x4df   : > { %3085 = vmatprep.subr.mxu0 %v3764_v0 }
 0x4e0   : > { %3086 = vmatpush3.msra.mxu0 %v1195_v6 }
 0x4e1   : > { %3087 = vmatprep.subr.mxu0 %v3764_v0 }
 0x4e2   : > { %3088 = vmatpush3.msra.mxu0 %v1194_v7 }
 0x4e3   : > { %3089 = vmatprep.subr.mxu0 %v3764_v0 }
 0x4e4   : > { %3090 = vmatpush3.msra.mxu0 %v1193_v8  ;;  %v1878_v8 = vld [vmem:[%s4441_s15 + $0x70] sm:$0xff] }
 0x4e5   : > { %3091 = vmatprep.subr.mxu0 %v3764_v0 }
 0x4e6   : > { %3092 = vmatpush3.msra.mxu0 %v1192_v9  ;;  %v1877_v9 = vld [vmem:[%s4441_s15 + $0x68] sm:$0xff] }
 0x4e7   : > { %3093 = vmatprep.subr.mxu0 %v3764_v0 }
 0x4e8   : > { %3094 = vmatpush3.msra.mxu0 %v1191_v19  ;;  %v1867_v19 = vld [vmem:[%s4441_s15 + $0x18] sm:$0xff] }
 0x4e9   : > { %3095 = vmatprep.subr.mxu0 %v3764_v0 }
 0x4ea   : > { %3096 = vmatpush3.msra.mxu0 %v1190_v20  ;;  %v1866_v20 = vld [vmem:[%s4441_s15 + $0x10] sm:$0xff] }
 0x4eb   : > { %3097 = vmatprep.subr.mxu0 %v3764_v0 }
 0x59d   : > { %v1530_v54 = vpop.f32.mrf.mxu0 }
 0x59e   : > { %v1531_v55 = vadd.f32 %v2935_v53, %v1530_v54 }
 0x59f   : > { %v3071_v56 = vpop.f32.mrf.mxu0 }
 0x5a0   : > { %v1534_v57 = vadd.f32 %v1531_v55, %v4140_v21  ;;  %v1189_v21 = vld [vmem:[%s4434_s11] sm:$0xff] }
 0x5a1   : > { %3098 = vmatpush3.msra.mxu0 %v1189_v21  ;;  %v1865_v21 = vld [vmem:[%s4441_s15 + $0x8] sm:$0xff] }
 0x5a2   : > { %v1535_v58 = vsel %vm1208_vm8, %v1534_v57, 0.0  ;;  %3113 = vmatprep.subr.mxu0 %v3764_v0 }
 0x5a3   : > { %1536 = vadd.xlane.f32.xlu1 %v1535_v58  ;;  %v1782_v58 = vld [vmem:[#allocation13 + $0x10] sm:$0xff] }
 0x62c   : > { %v1537_v59 = vpop.xlane.xlu1 %1536 }
 0x62d   : > { %v1539_v60 = vmul.f32 0.03125, %v1537_v59  ;;  %v1781_v59 = vld [vmem:[#allocation13 + $0x8] sm:$0xff] }
 0x62f   : > { %v1540_v61 = vsub.f32 %v1534_v57, %v1539_v60  ;;  %v1783_v57 = vld [vmem:[#allocation13 + $0x18] sm:$0xff]  ;;  %v1780_v60 = vld [vmem:[#allocation13] sm:$0xff] }
 0x631   : > { %v1541_v62 = vmul.f32 %v1540_v61, %v1540_v61 }
 0x633   : > { %v1542_v63 = vsel %vm1208_vm8, %v1541_v62, 0.0 }
 0x634   : > { %1543 = vadd.xlane.f32.xlu0 %v1542_v63 }
 0x6bd   : > { %v1544_v10 = vpop.xlane.xlu0 %1543 }
 0x6be   : > { %v1545_v11 = vmul.f32 0.03125, %v1544_v10  ;;  %v1876_v10 = vld [vmem:[%s4441_s15 + $0x60] sm:$0xff] }
 0x6c0   : > { %v1546_v12 = vadd.f32 1e-05, %v1545_v11  ;;  %v1875_v11 = vld [vmem:[%s4441_s15 + $0x58] sm:$0xff] }
 0x6c2   : > { %3370 = vrsqrt.f32 %v1546_v12  ;;  %v1874_v12 = vld [vmem:[%s4441_s15 + $0x50] sm:$0xff] }
 0x6cf   : > { %v3371_v13 = vpop.eup %3370 }
 0x6d0   : > { %v1548_v15 = vmul.f32 %v3371_v13, %v1540_v61  ;;  %v1879_v61 = vld [vmem:[%s4441_s15 + $0x78] sm:$0xff]  ;;  %v1873_v13 = vld [vmem:[%s4441_s15 + $0x48] sm:$0xff] }
 0x6d2   : > { %v1555_v17 = vmul.f32 %v2937_v14, %v1548_v15  ;;  %v1872_v14 = vld [vmem:[%s4441_s15 + $0x40] sm:$0xff]  ;;  %v1871_v15 = vld [vmem:[%s4441_s15 + $0x38] sm:$0xff] }
 0x6d4   : > { %v1562_v18 = vadd.f32 %v2938_v16, %v1555_v17  ;;  %v1870_v16 = vld [vmem:[%s4441_s15 + $0x30] sm:$0xff]  ;;  %v1869_v17 = vld [vmem:[%s4441_s15 + $0x28] sm:$0xff] }
 0x6d6   : > { %3081 = vmatmul.mubr.msk.f32.vlgmr.msra.gmra.mxu1 %vm1208_vm8, %v1562_v18 }
 0x6d7   : > { %3110 = vmatprep.mubr.msk.f32.mxu1 %vm3765_vm0, %v3764_v0  ;;  %3103 = vmatpush3.msra.mxu1 %v1783_v57 }
 0x6d8   : > { %3104 = vmatprep.subr.mxu1 %v3764_v0 }
 0x6d9   : > { %3105 = vmatpush3.msra.mxu1 %v1782_v58 }
 0x6da   : > { %3106 = vmatprep.subr.mxu1 %v3764_v0 }
 0x6db   : > { %3107 = vmatpush3.msra.mxu1 %v1781_v59 }
 0x6dc   : > { %3108 = vmatprep.subr.mxu1 %v3764_v0 }
 0x6dd   : > { %3109 = vmatpush3.msra.mxu1 %v1780_v60 }
 0x6de   : > { %1942 = vmatprep.subr.mxu1 %v1879_v61 }
 0x796   : > { %v1638_v23 = vpop.f32.mrf.mxu1 }
 0x797   : > { %v1639_v24 = vadd.f32 %v2939_v22, %v1638_v23  ;;  %v1864_v22 = vld [vmem:[%s4441_s15] sm:$0xff] }
 0x798   : > { %v3082_v25 = vpop.f32.mrf.mxu1  ;;  %v2947_v23 = vld [vmem:[#allocation15] ss:$0 sm:$0xff] }
 0x799   : > { %v1642_v26 = vmax.f32 %v1639_v24, 0.0 }
 0x79b   : > { %3100 = vmatmul.mubr.msk.f32.vlgmr.msra.gmra.mxu0 %vm1649_vm12, %v1642_v26 }
 0x79c   : > { %3115 = vmatprep.mubr.msk.f32.mxu0 %vm3765_vm0, %v3764_v0 }
 0x85b   : > { %v1719_v31 = vpop.f32.mrf.mxu0 }
 0x85c   : > { %v1720_v32 = vadd.f32 %v2941_v27, %v1719_v31  ;;  %v1880_v27 = vld [vmem:[%s4442_s27] sm:$0x3]  ;;  %s4342_s27 = scalar_lea.hbm %s3940_s14, %s2967_s5 }
 0x85d   : > { %v3101_v34 = vpop.f32.mrf.mxu0  ;;  %v1916_v31 = vrot.slane %v1880_v27, %v1363_v30  ;;  %v1919_v30 = vsub.s32 1, %v4158_v29 }
 0x85e   : > { %v1723_v35 = vadd.f32 %v1720_v32, %v1562_v18  ;;  %v1868_v18 = vld [vmem:[%s4441_s15 + $0x20] sm:$0xff] }
 0x860   : > { %v1724_v36 = vsel %vm1208_vm8, %v1723_v35, 0.0 }
 0x861   : > { %1725 = vadd.xlane.f32.xlu0 %v1724_v36 }
 0x8ea   : > { %v1726_v37 = vpop.xlane.xlu0 %1725 }
 0x8eb   : > { %v1727_v38 = vmul.f32 0.03125, %v1726_v37  ;;  %v1920_v37 = vrot.slane %v1880_v27, %v1919_v30  ;;  %v1897_v27 = vld [vmem:[#allocation16 + $0x38] sm:$0xff]  ;;  %v1890_v30 = vld [vmem:[#allocation16] sm:$0xff] }
 0x8ed   : > { %v1728_v39 = vsub.f32 %v1723_v35, %v1727_v38 }
 0x8ef   : > { %v1729_v40 = vmul.f32 %v1728_v39, %v1728_v39 }
 0x8f1   : > { %v1730_v41 = vsel %vm1208_vm8, %v1729_v40, 0.0 }
 0x8f2   : > { %1731 = vadd.xlane.f32.xlu0 %v1730_v41 }
 0x97b   : > { %v1732_v42 = vpop.xlane.xlu0 %1731 }
 0x97c   : > { %v1733_v43 = vmul.f32 0.03125, %v1732_v42 }
 0x97e   : > { %v1734_v44 = vadd.f32 1e-05, %v1733_v43 }
 0x980   : > { %3372 = vrsqrt.f32 %v1734_v44 }
 0x98d   : > { %v3373_v45 = vpop.eup %3372 }
 0x98e   : > { %v1736_v47 = vmul.f32 %v3373_v45, %v1728_v39 }
 0x990   : > { %v1743_v49 = vmul.f32 %v2943_v46, %v1736_v47 }
 0x992   : > { %v1750_v50 = vadd.f32 %v2944_v48, %v1743_v49 }
 0x994   : > { %v1753_v51 = vsel %vm1208_vm8, %v1750_v50, 0.0 }
 0x995   : > { %1754 = vadd.xlane.f32.xlu0 %v1753_v51 }
 0xa1e   : > { %v1755_v52 = vpop.xlane.xlu0 %1754 }
 0xa1f   : > { %v1756_v53 = vmul.f32 0.03125, %v1755_v52 }
 0xa21   : > { %v1757_v54 = vsub.f32 %v1750_v50, %v1756_v53 }
 0xa23   : > { %v1758_v55 = vmul.f32 %v1757_v54, %v1757_v54 }
 0xa25   : > { %v1759_v56 = vsel %vm1208_vm8, %v1758_v55, 0.0 }
 0xa26   : > { %1760 = vadd.xlane.f32.xlu0 %v1759_v56 }
 0xaaf   : > { %v1761_v62 = vpop.xlane.xlu0 %1760 }
 0xab0   : > { %v1762_v63 = vmul.f32 0.03125, %v1761_v62 }
 0xab2   : > { %v1763_v1 = vadd.f32 1e-05, %v1762_v63 }
 0xab4   : > { %3374 = vrsqrt.f32 %v1763_v1  ;;  %v1888_v1 = vld [vmem:[%s4443_s0 + $0x38] sm:$0xff]  ;;  %s2708_s0 = scalar_lea.sflag [#allocation6], %s1078_s28 }
 0xac1   : > { %v3375_v2 = vpop.eup %3374 }
 0xac2   : > { %v1765_v4 = vmul.f32 %v3375_v2, %v1757_v54  ;;  %v1887_v2 = vld [vmem:[%s4444_s18 + $0x30] sm:$0xff] }
 0xac4   : > { %v1772_v6 = vmul.f32 %v2945_v3, %v1765_v4  ;;  %v1886_v3 = vld [vmem:[%s4444_s18 + $0x28] sm:$0xff]  ;;  %v1885_v4 = vld [vmem:[%s4444_s18 + $0x20] sm:$0xff] }
 0xac6   : > { %v1779_v7 = vadd.f32 %v2946_v5, %v1772_v6  ;;  %v1884_v5 = vld [vmem:[%s4444_s18 + $0x18] sm:$0xff]  ;;  %v1883_v6 = vld [vmem:[%s4444_s18 + $0x10] sm:$0xff] }
 0xac8   : > { %3111 = vmatmul.mubr.msk.f32.vlgmr.msra.gmra.mxu1 %vm1208_vm8, %v1779_v7  ;;  %v1882_v7 = vld [vmem:[%s4444_s18 + $0x8] sm:$0xff] }
 0xac9   : > { %1943 = vmatpush1.msra.mxu1 %v1878_v8  ;;  %1990 = vmatprep.mubr.f32.mxu1 %v3764_v0 }
 0xaca   : > { %1944 = vmatprep.subr.mxu1 %v1877_v9 }
 0xacb   : > { %1945 = vmatpush1.msra.mxu1 %v1876_v10  ;;  %v1881_v10 = vld [vmem:[%s4444_s18] sm:$0xff] }
 0xacc   : > { %1946 = vmatprep.subr.mxu1 %v1875_v11 }
 0xacd   : > { %1947 = vmatpush1.msra.mxu1 %v1874_v12 }
 0xace   : > { %1948 = vmatprep.subr.mxu1 %v1873_v13 }
 0xacf   : > { %1949 = vmatpush1.msra.mxu1 %v1872_v14 }
 0xad0   : > { %1950 = vmatprep.subr.mxu1 %v1871_v15 }
 0xad1   : > { %1951 = vmatpush1.msra.mxu1 %v1870_v16 }
 0xad2   : > { %1952 = vmatprep.subr.mxu1 %v1869_v17 }
 0xad3   : > { %1953 = vmatpush1.msra.mxu1 %v1868_v18 }
 0xad4   : > { %1954 = vmatprep.subr.mxu1 %v1867_v19 }
 0xad5   : > { %1955 = vmatpush1.msra.mxu1 %v1866_v20 }
 0xad6   : > { %1956 = vmatprep.subr.mxu1 %v1865_v21 }
 0xad7   : > { %1957 = vmatpush1.msra.mxu1 %v1864_v22 }
 0xad8   : > { %3128 = vmatprep.subr.mxu1 %v3764_v0 }
 0xb88   : > { %v1860_v24 = vpop.f32.mrf.mxu1 }
 0xb89   : > { %v4245_v25 = vadd.f32 %v2947_v23, %v1860_v24 }
 0xb8a   : > { %v3112_v26 = vpop.f32.mrf.mxu1 }
 0xb8b   : > { %2949 = vmatmul.mubr.msk.f32.vlgmr.msra.gmra.mxu1 %vm1649_vm12, %v4245_v25 }
 0xb8c   : > { %3130 = vmatprep.mubr.msk.f32.mxu1 %vm3765_vm0, %v3764_v0 }
 0xc4b   : > { %v1992_v32 = vpop.f32.mrf.mxu1 }
 0xc4c   : > { %v1993_v34 = vadd.f32 %v1992_v32, %v1916_v31  ;;  %v1896_v31 = vld [vmem:[#allocation16 + $0x30] sm:$0xff]  ;;  %v1895_v32 = vld [vmem:[#allocation16 + $0x28] sm:$0xff] }
 0xc4d   : > { %v1994_v38 = vpop.f32.mrf.mxu1 }
 0xc4e   : > { %2004 = vrot.lane.b32.xlu1 %v1993_v34, %s3768_s30  ;;  %1998 = vrot.lane.b32.xlu0 %v1993_v34, %s3766_s4  ;;  %v1995_v40 = vadd.f32 %v1994_v38, %v1920_v37  ;;  %v1906_v37 = vld [vmem:[#allocation18 + $0x38] sm:$0xff]  ;;  %v1905_v38 = vld [vmem:[#allocation18 + $0x30] sm:$0xff] }
 0xcc0   : > { %v2005_v35 = vpop.permute.xlu1 %2004  ;;  %v1999_v36 = vpop.permute.xlu0 %1998 }
 0xcc1   : > { %3114 = vmatpush3.xpose.msk.msra.mxu0 %vm1208_vm8, %v2005_v35  ;;  %2080 = vrot.lane.b32.xlu1 %v1999_v36, %s3768_s30  ;;  %s3769_s30 = smov 32   ;;  %v1892_v35 = vld [vmem:[#allocation16 + $0x10] sm:$0xff] }
 0xcc2   : > { %3118 = vmatprep.subr.mxu0 %v3764_v0 }
 0xcc4   : > { %3116 = vmatmul.mubr.msk.f32.vlgmr.msra.gmra.mxu0 %vm1208_vm8, %v1993_v34  ;;  %v1893_v34 = vld [vmem:[#allocation16 + $0x18] sm:$0xff] }
 0xcc5   : > { %3120 = vmatprep.mubr.msk.f32.mxu0 %vm3765_vm0, %v3764_v0 }
 0xd33   : > { %v2081_v39 = vpop.permute.xlu1 %2080 }
 0xd34   : > { %3119 = vmatpush3.xpose.msk.msra.mxu0 %vm1208_vm8, %v2081_v39  ;;  %v1904_v39 = vld [vmem:[#allocation18 + $0x28] sm:$0xff] }
 0xd35   : > { %3123 = vmatprep.subr.mxu0 %v3764_v0 }
 0xd37   : > { %3121 = vmatmul.mubr.msk.f32.vlgmr.msra.gmra.mxu0 %vm1208_vm8, %v1999_v36  ;;  %v1891_v36 = vld [vmem:[#allocation16 + $0x8] sm:$0xff] }
 0xd38   : > { %3124 = vmatpush3.msra.mxu0 %v1995_v40  ;;  %3125 = vmatprep.mubr.msk.f32.mxu0 %vm3765_vm0, %v3764_v0 }
 0xd39   : > { %3133 = vmatprep.subr.mxu0 %v3764_v0 }
 0xd84   : > { %v2076_v41 = vpop.f32.mrf.mxu0 }
 0xd85   : > { %v2156_v29 = vsel %vm1365_vm10, %v2076_v41, -1e+30  ;;  %v1902_v41 = vld [vmem:[#allocation18 + $0x18] sm:$0xff] }
 0xd86   : > { %v3117_v42 = vpop.f32.mrf.mxu0  ;;  %v2158_v43 = vsel %vm1367_vm11, %v2156_v29, -inf }
 0xd87   : > { %2159 = vmax.xlane.f32.xlu1 %v2158_v43 }
 0xdf7   : > { %v2152_v44 = vpop.f32.mrf.mxu0 }
 0xdf8   : > { %v2157_v45 = vsel %vm1365_vm10, %v2152_v44, -1e+30 }
 0xdf9   : > { %v3122_v46 = vpop.f32.mrf.mxu0  ;;  %v2161_v47 = vsel %vm1367_vm11, %v2157_v45, -inf }
 0xdfa   : > { %2162 = vmax.xlane.f32.xlu0 %v2161_v47  ;;  %v2959_v47 = vld [vmem:[%s3924_s10] ss:$0 sm:$0xff] }
 0xe10   : > { %v2160_v48 = vpop.xlane.xlu1 %2159 }
 0xe11   : > { %v2164_v49 = vsub.f32 %v2156_v29, %v2160_v48 }
 0xe13   : > { %v2166_v50 = vmul.f32 1.442695, %v2164_v49 }
 0xe15   : > { %3376 = vpow2.f32 %v2166_v50  ;;  %v1901_v50 = vld [vmem:[#allocation18 + $0x10] sm:$0xff] }
 0xe22   : > { %v3377_v51 = vpop.eup %3376 }
 0xe23   : > { %v2170_v52 = vsel %vm1367_vm11, %v3377_v51, 0.0 }
 0xe24   : > { %2171 = vadd.xlane.f32.xlu1 %v2170_v52  ;;  %v1899_v52 = vld [vmem:[#allocation18] sm:$0xff] }
 0xe83   : > { %v2163_v53 = vpop.xlane.xlu0 %2162 }
 0xe84   : > { %v2165_v54 = vsub.f32 %v2157_v45, %v2163_v53  ;;  %v2958_v45 = vld [vmem:[%s4446_s23] ss:$0 sm:$0xff] }
 0xe85   : > { %v2960_v53 = vld [vmem:[%s4447_s2] ss:$0 sm:$0xff] }
 0xe86   : > { %v2168_v55 = vmul.f32 1.442695, %v2165_v54 }
 0xe88   : > { %3378 = vpow2.f32 %v2168_v55 }
 0xe95   : > { %v3379_v56 = vpop.eup %3378 }
 0xe96   : > { %v2173_v33 = vsel %vm1367_vm11, %v3379_v56, 0.0 }
 0xe97   : > { %2174 = vadd.xlane.f32.xlu0 %v2173_v33 }
 0xead   : > { %2001 = vrot.lane.b32.xlu0 %v1995_v40, %s3766_s4  ;;  %v2172_v57 = vpop.xlane.xlu1 %2171  ;;  %s4445_s4 = sld [smem:[#allocation40_spill]]  ;;  %v1903_v40 = vld [vmem:[#allocation18 + $0x20] sm:$0xff] }
 0xeae   : > { %3380 = vrcp.f32 %v2172_v57  ;;  %v2962_v57 = vld [vmem:[%s4448_s7] ss:$0 sm:$0xff] }
 0xeb3   : > { %v2956_v15 = vld [vmem:[%s4445_s4] ss:$0 sm:$0xff]  ;;  %s3636_s4 = scalar_lea.vmem %s2721_s26, 16 }
 0xeb4   : > { %p3637_p1 = scmp.ne.s32.totalorder %s2721_s26, %s3636_s4 }
 0xeb6   : > { %p3638_p7 = pnand %p3637_p1, %p4449_p8 }
 0xeb8   : > { %p3639_p9 = pneg %p3638_p7 }
 0xebb   : > { %v3381_v58 = vpop.eup %3380 }
 0xebc   : > { %v2178_v59 = vmul.f32 %v3381_v58, %v3377_v51  ;;  %v1900_v51 = vld [vmem:[#allocation18 + $0x8] sm:$0xff] }
 0xebe   : > { %3126 = vmatmul.mubr.msk.f32.vlgmr.msra.gmra.mxu0 %vm1367_vm11, %v2178_v59 }
 0xebf   : > { %3149 = vmatprep.mubr.msk.f32.mxu0 %vm3765_vm0, %v3764_v0  ;;  %3134 = vmatpush3.msra.mxu0 %v1888_v1 }
 0xec0   : > { %3135 = vmatprep.subr.mxu0 %v3764_v0 }
 0xec1   : > { %3136 = vmatpush3.msra.mxu0 %v1887_v2 }
 0xec2   : > { %3137 = vmatprep.subr.mxu0 %v3764_v0 }
 0xec3   : > { %3138 = vmatpush3.msra.mxu0 %v1886_v3 }
 0xec4   : > { %3139 = vmatprep.subr.mxu0 %v3764_v0 }
 0xec5   : > { %3140 = vmatpush3.msra.mxu0 %v1885_v4  ;;  %v2700_v4 = vsel %vm2699_vm13, %v4156_v28, 0.0 }
 0xec6   : > { %3141 = vmatprep.subr.mxu0 %v3764_v0 }
 0xec7   : > { %3142 = vmatpush3.msra.mxu0 %v1884_v5 }
 0xec8   : > { %3143 = vmatprep.subr.mxu0 %v3764_v0 }
 0xec9   : > { %3144 = vmatpush3.msra.mxu0 %v1883_v6 }
 0xeca   : > { %3145 = vmatprep.subr.mxu0 %v3764_v0 }
 0xecb   : > { %3146 = vmatpush3.msra.mxu0 %v1882_v7 }
 0xecc   : > { %3147 = vmatprep.subr.mxu0 %v3764_v0 }
 0xecd   : > { %3148 = vmatpush3.msra.mxu0 %v1881_v10 }
 0xece   : > { %3171 = vmatprep.subr.mxu0 %v3764_v0 }
 0xf20   : > { %v2175_v60 = vpop.xlane.xlu0 %2174 }
 0xf21   : > { %3382 = vrcp.f32 %v2175_v60 }
 0xf24   : > { %v2002_v61 = vpop.permute.xlu0 %2001 }
 0xf25   : > { %3129 = vmatpush3.msra.mxu1 %v2002_v61 }
 0xf26   : > { %3152 = vmatprep.subr.mxu1 %v3764_v0 }
 0xf2e   : > { %v3383_v62 = vpop.eup %3382 }
 0xf2f   : > { %v2179_v63 = vmul.f32 %v3383_v62, %v3379_v56 }
 0xf31   : > { %3131 = vmatmul.mubr.msk.f32.vlgmr.msra.gmra.mxu1 %vm1367_vm11, %v2179_v63 }
 0xf32   : > { %3168 = vmatprep.mubr.msk.f32.mxu1 %vm3765_vm0, %v3764_v0  ;;  %3153 = vmatpush3.msra.mxu1 %v1897_v27 }
 0xf33   : > { %3154 = vmatprep.subr.mxu1 %v3764_v0 }
 0xf34   : > { %3155 = vmatpush3.msra.mxu1 %v1896_v31 }
 0xf35   : > { %3156 = vmatprep.subr.mxu1 %v3764_v0 }
 0xf36   : > { %3157 = vmatpush3.msra.mxu1 %v1895_v32 }
 0xf37   : > { %3158 = vmatprep.subr.mxu1 %v3764_v0 }
 0xf7e   : > { %v2249_v8 = vpop.f32.mrf.mxu0 }
 0xf80   : > { %v3127_v9 = vpop.f32.mrf.mxu0 }
 0xf81   : > { %v2964_v9 = vld [vmem:[%s3929_s3] ss:$0 sm:$0xff] }
 0xff1   : > { %v2322_v11 = vpop.f32.mrf.mxu1 }
 0xff2   : > { %2327 = vrot.lane.b32.xlu1 %v2322_v11, %s3769_s30  ;;  %v2965_v11 = vld [vmem:[%s3935_s22] ss:$0 sm:$0xff]  ;;  %s3770_s30 = smov [#allocation19]  }
 0xff3   : > { %v3132_v12 = vpop.f32.mrf.mxu1  ;;  %s3640_s23 = sshll.u32 %s3770_s30, 4  ;;  %s3641_s23 = int_to_ptr.vmem [resolvable:$false] %s3640_s23 }
 0xff4   : > { %s3642_s6 = scalar_lea.vmem %s3641_s23, 32  ;;  %p3643_p4 = scmp.lt.s32.totalorder %s2721_s26, %s3641_s23 }
 0xff5   : > { %p3644_p12 = scmp.lt.s32.totalorder %s3642_s6, %s3636_s4 }
 0xff7   : > { %p3645_p13 = por %p3644_p12, %p3643_p4 }
 0xff9   : > { %p3646_p2 = pnand %p3645_p13, %p3639_p9 }
0x1064   : > { %v2328_v13 = vpop.permute.xlu1 %2327 }
0x1065   : > { %v2330_v14 = vsel %vm1208_vm8, %v2249_v8, %v2328_v13 }
0x1066   : > { %3150 = vmatmul.mubr.msk.f32.vlgmr.msra.gmra.mxu0 %vm1649_vm12, %v2330_v14 }
0x1067   : > { %3187 = vmatprep.mubr.msk.f32.mxu0 %vm3765_vm0, %v3764_v0  ;;  %3172 = vmatpush3.msra.mxu0 %v1906_v37 }
0x1068   : > { %3173 = vmatprep.subr.mxu0 %v3764_v0 }
0x1069   : > { %3174 = vmatpush3.msra.mxu0 %v1905_v38 }
0x106a   : > { %3175 = vmatprep.subr.mxu0 %v3764_v0 }
0x106b   : > { %3176 = vmatpush3.msra.mxu0 %v1904_v39 }
0x106c   : > { %3177 = vmatprep.subr.mxu0 %v3764_v0 }
0x106d   : > { %3178 = vmatpush3.msra.mxu0 %v1903_v40 }
0x106e   : > { %3179 = vmatprep.subr.mxu0 %v3764_v0 }
0x106f   : > { %3180 = vmatpush3.msra.mxu0 %v1902_v41 }
0x1070   : > { %3181 = vmatprep.subr.mxu0 %v3764_v0 }
0x1071   : > { %3182 = vmatpush3.msra.mxu0 %v1901_v50 }
0x1072   : > { %3183 = vmatprep.subr.mxu0 %v3764_v0 }
0x1073   : > { %3184 = vmatpush3.msra.mxu0 %v1900_v51 }
0x1074   : > { %3185 = vmatprep.subr.mxu0 %v3764_v0 }
0x1075   : > { %3186 = vmatpush3.msra.mxu0 %v1899_v52 }
0x1126   : > { %v2406_v16 = vpop.f32.mrf.mxu0 }
0x1127   : > { %v2407_v17 = vadd.f32 %v2956_v15, %v2406_v16 }
0x1128   : > { %v3151_v18 = vpop.f32.mrf.mxu0 }
0x1129   : > { %v2410_v19 = vadd.f32 %v2407_v17, %v4245_v25  ;;  %v1894_v25 = vld [vmem:[#allocation16 + $0x20] sm:$0xff] }
0x112a   : > { %3159 = vmatpush3.msra.mxu1 %v1894_v25 }
0x112b   : > { %v2411_v20 = vsel %vm1649_vm12, %v2410_v19, 0.0  ;;  %3160 = vmatprep.subr.mxu1 %v3764_v0 }
0x112c   : > { %2412 = vadd.xlane.f32.xlu0 %v2411_v20  ;;  %3161 = vmatpush3.msra.mxu1 %v1893_v34 }
0x112d   : > { %3162 = vmatprep.subr.mxu1 %v3764_v0 }
0x112e   : > { %3163 = vmatpush3.msra.mxu1 %v1892_v35 }
0x112f   : > { %3164 = vmatprep.subr.mxu1 %v3764_v0 }
0x1130   : > { %3165 = vmatpush3.msra.mxu1 %v1891_v36 }
0x1131   : > { %3166 = vmatprep.subr.mxu1 %v3764_v0 }
0x1132   : > { %3167 = vmatpush3.msra.mxu1 %v1890_v30 }
0x1133   : > { %3190 = vmatprep.subr.mxu1 %v3764_v0 }
0x11b5   : > { %v2413_v21 = vpop.xlane.xlu0 %2412 }
0x11b6   : > { %v2415_v22 = vmul.f32 0.015625, %v2413_v21 }
0x11b8   : > { %v2416_v23 = vsub.f32 %v2410_v19, %v2415_v22 }
0x11ba   : > { %v2417_v24 = vmul.f32 %v2416_v23, %v2416_v23 }
0x11bc   : > { %v2418_v26 = vsel %vm1649_vm12, %v2417_v24, 0.0 }
0x11bd   : > { %2419 = vadd.xlane.f32.xlu1 %v2418_v26 }
0x11c1   : > { %2701 = vadd.xlane.f32.xlu1 %v2700_v4 }
0x1246   : > { %v2420_v29 = vpop.xlane.xlu1 %2419 }
0x1247   : > { %v2421_v42 = vmul.f32 0.015625, %v2420_v29 }
0x1249   : > { %v2422_v43 = vadd.f32 1e-05, %v2421_v42 }
0x124a   : > { %v2702_v14 = vpop.xlane.xlu1 %2701 }
0x124b   : > { %3384 = vrsqrt.f32 %v2422_v43 }
0x1258   : > { %v3385_v44 = vpop.eup %3384 }
0x1259   : > { %v2424_v46 = vmul.f32 %v3385_v44, %v2416_v23 }
0x125b   : > { %v2431_v48 = vmul.f32 %v2958_v45, %v2424_v46 }
0x125d   : > { %v2438_v49 = vadd.f32 %v2959_v47, %v2431_v48 }
0x125f   : > { %3169 = vmatmul.mubr.msk.f32.vlgmr.msra.gmra.mxu1 %vm1649_vm12, %v2438_v49 }
0x1260   : > { %3192 = vmatprep.mubr.msk.f32.mxu1 %vm3765_vm0, %v3764_v0 }
0x131f   : > { %v2514_v54 = vpop.f32.mrf.mxu1 }
0x1320   : > { %v2515_v55 = vadd.f32 %v2960_v53, %v2514_v54 }
0x1321   : > { %v3170_v56 = vpop.f32.mrf.mxu1 }
0x1322   : > { %v2518_v33 = vmax.f32 %v2515_v55, 0.0 }
0x1324   : > { %3188 = vmatmul.mubr.msk.f32.vlgmr.msra.gmra.mxu0 %vm1649_vm12, %v2518_v33 }
0x13e4   : > { %v2594_v58 = vpop.f32.mrf.mxu0 }
0x13e5   : > { %v2595_v59 = vadd.f32 %v2962_v57, %v2594_v58 }
0x13e6   : > { %v3189_v60 = vpop.f32.mrf.mxu0 }
0x13e7   : > { %v2598_v61 = vadd.f32 %v2595_v59, %v2438_v49 }
0x13e9   : > { %v2599_v62 = vsel %vm1649_vm12, %v2598_v61, 0.0 }
0x13ea   : > { %2600 = vadd.xlane.f32.xlu0 %v2599_v62 }
0x1473   : > { %v2601_v63 = vpop.xlane.xlu0 %2600 }
0x1474   : > { %v2602_v0 = vmul.f32 0.015625, %v2601_v63 }
0x1476   : > { %v2603_v1 = vsub.f32 %v2598_v61, %v2602_v0 }
0x1478   : > { %v2604_v2 = vmul.f32 %v2603_v1, %v2603_v1 }
0x147a   : > { %v2605_v3 = vsel %vm1649_vm12, %v2604_v2, 0.0 }
0x147b   : > { %2606 = vadd.xlane.f32.xlu0 %v2605_v3 }
0x1504   : > { %v2607_v5 = vpop.xlane.xlu0 %2606 }
0x1505   : > { %v2608_v6 = vmul.f32 0.015625, %v2607_v5 }
0x1507   : > { %v2609_v7 = vadd.f32 1e-05, %v2608_v6 }
0x1509   : > { %3386 = vrsqrt.f32 %v2609_v7 }
0x150a   : > { %3388 = vrsqrt.f32 %v2702_v14 }
0x1516   : > { %v3387_v8 = vpop.eup %3386 }
0x1517   : > { %v2611_v10 = vmul.f32 %v3387_v8, %v2603_v1  ;;  %v3389_v15 = vpop.eup %3388 }
0x1519   : > { %v2618_v12 = vmul.f32 %v2964_v9, %v2611_v10 }
0x151b   : > { %v2625_v13 = vadd.f32 %v2965_v11, %v2618_v12 }
0x151d   : > { %3191 = vmatpush3.msra.mxu1 %v2625_v13 }
0x151e   : > { %3193 = vmatmul.mubr.msk.f32.vlgmr.msra.gmra.mxu1 %vm1367_vm11, %v4156_v28 }
0x15de   : > { %v2695_v16 = vpop.f32.mrf.mxu1 }
0x15df   : > { %v2704_v17 = vmul.f32 %v3389_v15, %v2695_v16 }
0x15e0   : > { %v3194_v18 = vpop.f32.mrf.mxu1 }
0x15e1   : > { %2706 = vst.msk [vmem:[%s1079_s1] sm:$0x1] %vm2705_vm14, %v2704_v17 }
0x15e2   : > { %3649 = shalt.err (!%p3646_p2)
}
0x15e3   : > { %s3650_s2 = scalar_lea.hbm %s4342_s27, 16  ;;  %s3654_s7 = scalar_lea.hbm %s3940_s14, 32 }
0x15e4   : > { %p3651_p3 = scmp.ne.s32.totalorder %s4342_s27, %s3650_s2  ;;  %p3655_p6 = scmp.lt.s32.totalorder %s4342_s27, %s3940_s14 }
0x15e5   : > { %p3656_p10 = scmp.lt.s32.totalorder %s3654_s7, %s3650_s2 }
0x15e6   : > { %p3652_p5 = pnand %p3651_p3, %p4449_p8 }
0x15e7   : > { %p3657_p11 = por %p3656_p10, %p3655_p6 }
0x15e8   : > { %p3653_p0 = pneg %p3652_p5 }
0x15ea   : > { %p3658_p1 = pnand %p3657_p11, %p3653_p0 }
0x15ec   : > { %3661 = shalt.err (!%p3658_p1)
}
0x15ed   : > { %3231 = dma.vmem_to_hbm [thread:$0]  (%p4449_p8), %s2721_s26, 16, %s4342_s27, %s2708_s0  }
0x15ee PF: > { %s4450_s28 = sld [smem:[#allocation47_spill]] }
0x15ef   : > { %s4451_s5 = sld [smem:[#allocation45_spill]] }
0x15f0   : > { %s4452_s1 = sld [smem:[#allocation50_spill]] }
0x15f4   : > { %p3283_p7 = scmp.ge.s32.totalorder %s4450_s28, 2 }
0x15f5   : > { %s2732_s4 = sand.u32 1, %s4451_s5  }
0x15f6   : > { %p4453_p9 = scmp.ne.s32.totalorder %s4452_s1, 0  ;;  %s2733_s30 = scalar_lea.sflag [#allocation6], %s2732_s4 }
0x15f8   : > { %p3262_p4 = pnand %p3283_p7, %p4453_p9 }
0x15fa   : > { %p3263_p12 = pneg %p3262_p4 }
0x15fc   : > { %3701 = dma.done.wait (%p3263_p12), %s2733_s30, 16  }
0x15fd   : > { %3703 = vsyncadd (%p3263_p12), %s2733_s30, 4294967280  ;;  %s4454_s2 = sld [smem:[#allocation48_spill]]  ;;  %s4457_s0 = smov %s3710_s19 }
0x15fe   : > { %s4455_s23 = sld [smem:[#allocation46_spill]] }
0x15ff   : > { %s4456_s30 = sld [smem:[#allocation49_spill]] }
0x1603   : > { %p86_p13 = scmp.ge.s32.totalorder %s4454_s2, 4  }
0x1604   : > { %s4458_s19 = smov %s4455_s23 }
0x1605   :  { %88 = sbr.rel (!%p86_p13) target bundleno = 67 (0x43), region = 256 }
0x160a   :  { %2737 = vsyncpa [#allocation5], 1 }
0x160b   :  { %2739 = vsyncpa [#allocation5 + $0x1], 1 }
0x160c   :  { %2740 = vsyncpa [#allocation8], 1 }
0x160d   :  { %2741 = vsyncpa [#allocation11], 1 }
0x160e   :  { %2742 = vsyncpa [#allocation14], 1 }
0x160f   :  { %2743 = vsyncpa [#allocation17], 1 }
0x1610   :  { %2744 = vsyncpa [#allocation6], 1 }
0x1611   :  { %2746 = vsyncpa [#allocation6 + $0x1], 1 }

</bundles_post_ra>
